<compile_context>
chip_gen: v5e
topology: v5e:2x2
jax: 0.10.0
libtpu: 0.0.40
codegen_flags: <defaults>
</compile_context>

<pallas_src>
import functools

import jax
import jax.numpy as jnp
import numpy as np
from jax.experimental import pallas as pl
from jax.experimental.pallas import tpu as pltpu

EPS = 1e-5
LEAKY_SLOPE = 0.2


# --------------------------------- kernel ------------------------------------ #
def _residual_block_kernel(
    x_ref,        # (N, H+2, W*Cin)        bf16  vertically padded input slab
    w_ref,        # (3, W*Cin+W*Cout, 2*W*Cout) bf16 banded weights
                  #    rows [0, W*Cin)      : fused [conj | conv1] band
                  #    rows [W*Cin, +W*Cout): conv2 band (cols [0, W*Cout))
    bn_ref,       # (4, 2*W*Cout) f32 per-lane BN params:
                  #    row0 gamma[conj|conv1], row1 beta[conj|conv1],
                  #    row2 gamma2 (lanes [0,W*Cout)), row3 beta2
    out_ref,      # (N*H, W*Cout) f32 lane-dense output slab
    ypad_scr,     # scratch (N, H+2, W*Cout) bf16
    *, N, H, W, Cin, Cout,
):
    WCi = W * Cin
    WCo = W * Cout
    NH = N * H
    inv_R = 1.0 / (N * H * W)          # BN sample count per channel

    # Channel-fold projection P: P[k, l] = 1 iff lanes k and l carry the same
    # channel.  (1, WCo) @ P sums each channel's W lanes and broadcasts the
    # per-channel total back to that channel's lanes, so BN stats never leave
    # the lane-dense layout (tiny matmul on the otherwise idle MXU).
    k_id = jax.lax.broadcasted_iota(jnp.int32, (WCo, WCo), 0)
    l_id = jax.lax.broadcasted_iota(jnp.int32, (WCo, WCo), 1)
    if (Cout & (Cout - 1)) == 0:       # power-of-two channel count
        ch_k, ch_l = k_id & (Cout - 1), l_id & (Cout - 1)
    else:
        ch_k, ch_l = k_id % Cout, l_id % Cout
    P = (ch_k == ch_l).astype(jnp.float32)

    def batch_norm(y, g_lane, b_lane):
        # training-mode BN, centered two-pass form, all lane-dense f32.
        s = jnp.sum(y, axis=0, keepdims=True)                        # (1, WCo)
        mean = jnp.dot(s, P, preferred_element_type=jnp.float32) * inv_R
        yc = y - mean
        ss = jnp.sum(yc * yc, axis=0, keepdims=True)
        var = jnp.dot(ss, P, preferred_element_type=jnp.float32) * inv_R
        return yc * (g_lane * jax.lax.rsqrt(var + EPS)) + b_lane

    def leaky(v):
        return jnp.where(v > 0, v, LEAKY_SLOPE * v)

    # ---- fused conj_conv + conv1: 3 banded matmuls (one per vertical tap) ----
    x = x_ref[...]                                    # (N, H+2, WCi) bf16
    acc = jnp.zeros((NH, 2 * WCo), jnp.float32)
    for di in range(3):
        xs = x[:, di:di + H, :].reshape(NH, WCi)
        acc = acc + jnp.dot(xs, w_ref[di, :WCi, :],
                            preferred_element_type=jnp.float32)

    # vreg-aligned split at lane WCo (=128): [conj | conv1]
    z = batch_norm(acc[:, :WCo], bn_ref[0:1, :WCo], bn_ref[1:2, :WCo])
    y = leaky(batch_norm(acc[:, WCo:], bn_ref[0:1, WCo:], bn_ref[1:2, WCo:]))

    # ---- vertical re-pad for conv2 (horizontal pad is inside the weights) ----
    zrow = jnp.zeros((N, 1, WCo), ypad_scr.dtype)
    ypad_scr[:, 0:1, :] = zrow
    ypad_scr[:, H + 1:H + 2, :] = zrow
    ypad_scr[:, 1:H + 1, :] = y.reshape(N, H, WCo).astype(ypad_scr.dtype)

    # ---- conv2: 3 banded matmuls + BN ----------------------------------------
    yp = ypad_scr[...]                                # (N, H+2, WCo) bf16
    acc2 = jnp.zeros((NH, WCo), jnp.float32)
    for di in range(3):
        ys = yp[:, di:di + H, :].reshape(NH, WCo)
        acc2 = acc2 + jnp.dot(ys, w_ref[di, WCi:WCi + WCo, :WCo],
                              preferred_element_type=jnp.float32)
    y2 = batch_norm(acc2, bn_ref[2:3, :WCo], bn_ref[3:4, :WCo])

    # ---- residual add + activation, full-lane (NH, WCo) store ----------------
    out_ref[...] = leaky(y2 + z)


# ----------------------------- parameter packing ------------------------------ #
def _banded_weights(w_hwio, W):
    """(3, 3, Ci, Co) HWIO conv weight -> (3, W*Ci, W*Co) banded matrices.

    For each vertical tap di:  out_row += in_row(shifted by di) @ B_di
    computes the horizontal SAME 3-tap convolution over the lane-interleaved
    (pixel, channel) layout; the horizontal zero padding is folded into the
    band structure (boundary pixels just get a narrower band)."""
    kh, kw, Ci, Co = w_hwio.shape
    rin = jnp.arange(W * Ci)
    rout = jnp.arange(W * Co)
    jp, ci = rin // Ci, rin % Ci        # input pixel column, input channel
    j, co = rout // Co, rout % Co       # output pixel column, output channel
    dj = jp[:, None] - j[None, :] + (kw // 2)
    valid = (dj >= 0) & (dj < kw)
    djc = jnp.clip(dj, 0, kw - 1)
    vals = w_hwio[:, djc, ci[:, None], co[None, :]]   # (kh, W*Ci, W*Co)
    return jnp.where(valid[None], vals, 0.0)


def prepare_params(params, W):
    """One-time packing of module parameters into the two kernel operands.

    Conv biases are dropped: under training-mode BatchNorm the mean
    subtraction cancels any per-channel bias (the pure-JAX reference keeps the
    biases to prove it)."""
    Cin, Cout = params["w1"].shape[2], params["w1"].shape[3]
    WCi, WCo = W * Cin, W * Cout

    wf = jnp.concatenate([_banded_weights(params["wc"], W),
                          _banded_weights(params["w1"], W)],
                         axis=-1)                          # (3, WCi, 2*WCo)
    w2 = _banded_weights(params["w2"], W)                  # (3, WCo, WCo)

    wslab = jnp.zeros((3, WCi + WCo, 2 * WCo), jnp.float32)
    wslab = wslab.at[:, :WCi, :].set(wf)
    wslab = wslab.at[:, WCi:, :WCo].set(w2)
    wslab = wslab.astype(jnp.bfloat16)

    def lane(v):                        # per-channel (C,) -> per-lane (W*C,)
        return jnp.tile(v, W)

    zeros = jnp.zeros((WCo,), jnp.float32)
    bn = jnp.stack([
        jnp.concatenate([lane(params["gc"]), lane(params["g1"])]),
        jnp.concatenate([lane(params["bec"]), lane(params["be1"])]),
        jnp.concatenate([lane(params["g2"]), zeros]),
        jnp.concatenate([lane(params["be2"]), zeros]),
    ]).astype(jnp.float32)                                  # (4, 2*WCo)
    return wslab, bn


# --------------------------------- wrapper ------------------------------------ #
def _full_spec(arr):
    # whole-array block (block shape == array shape), single grid step
    return pl.BlockSpec(arr.shape, lambda i, nd=arr.ndim: (0,) * nd)


@jax.jit
def residual_block2_forward(x_nchw, wslab, bn):
    """Forward pass of ResidualBlock2 (conj path active).  x is NCHW f32."""
    N, Cin, H, W = x_nchw.shape
    Cout = bn.shape[1] // (2 * W)

    # NCHW -> lane-dense (W,C)-interleaved slab with a 1-row vertical pad,
    # cast to bf16 for the MXU.  Under jit this is one fused XLA relayout.
    x_slab = jnp.transpose(x_nchw, (0, 2, 3, 1)).reshape(N, H, W * Cin)
    x_slab = jnp.pad(x_slab, ((0, 0), (1, 1), (0, 0))).astype(jnp.bfloat16)

    args = (x_slab, wslab, bn)
    out_slab = pl.pallas_call(
        functools.partial(_residual_block_kernel,
                          N=N, H=H, W=W, Cin=Cin, Cout=Cout),
        out_shape=jax.ShapeDtypeStruct((N * H, W * Cout), jnp.float32),
        grid=(1,),
        in_specs=[_full_spec(a) for a in args],
        out_specs=pl.BlockSpec((N * H, W * Cout), lambda i: (0, 0)),
        scratch_shapes=[pltpu.VMEM((N, H + 2, W * Cout), jnp.bfloat16)],
        compiler_params=pltpu.CompilerParams(
            dimension_semantics=("arbitrary",)),
    )(*args)

    # lane-dense slab -> NHWC -> NCHW
    return jnp.transpose(out_slab.reshape(N, H, W, Cout), (0, 3, 1, 2))


# ------------------------------ pure-JAX reference ---------------------------- #
def _conv_ref(x_nhwc, w_hwio, b):
    y = jax.lax.conv_general_dilated(
        x_nhwc, w_hwio, window_strides=(1, 1), padding="SAME",
        dimension_numbers=("NHWC", "HWIO", "NHWC"))
    return y + b.reshape(1, 1, 1, -1)


def _bn_ref(y, g, b):
    mean = jnp.mean(y, axis=(0, 1, 2), keepdims=True)
    var = jnp.mean((y - mean) ** 2, axis=(0, 1, 2), keepdims=True)
    return (y - mean) * jax.lax.rsqrt(var + EPS) * g.reshape(1, 1, 1, -1) \
        + b.reshape(1, 1, 1, -1)


def _leaky_ref(y):
    return jnp.where(y > 0, y, LEAKY_SLOPE * y)


def residual_block2_reference(x_nchw, p):
    # Reference keeps the conv biases (the kernel drops them as BN-redundant).
    x = jnp.transpose(x_nchw, (0, 2, 3, 1)).astype(jnp.float32)
    z = _bn_ref(_conv_ref(x, p["wc"], p["bc"]), p["gc"], p["bec"])
    y = _leaky_ref(_bn_ref(_conv_ref(x, p["w1"], p["b1"]), p["g1"], p["be1"]))
    y = _bn_ref(_conv_ref(y, p["w2"], p["b2"]), p["g2"], p["be2"])
    out = _leaky_ref(y + z)
    return jnp.transpose(out, (0, 3, 1, 2))


# --------------------------------- params ------------------------------------- #
def init_params(key, cin, cout):
    keys = jax.random.split(key, 12)

    def w(k, ci, co):   # HWIO conv weights
        return 0.1 * jax.random.normal(k, (3, 3, ci, co), jnp.float32)

    def b(k, co):
        return 0.05 * jax.random.normal(k, (co,), jnp.float32)

    return {
        "wc": w(keys[0], cin, cout), "bc": b(keys[1], cout),
        "w1": w(keys[2], cin, cout), "b1": b(keys[3], cout),
        "w2": w(keys[4], cout, cout), "b2": b(keys[5], cout),
        # BN affine params (slightly off 1/0 so they actually matter)
        "gc": 1.0 + 0.1 * jax.random.normal(keys[6], (cout,), jnp.float32),
        "bec": 0.1 * jax.random.normal(keys[7], (cout,), jnp.float32),
        "g1": 1.0 + 0.1 * jax.random.normal(keys[8], (cout,), jnp.float32),
        "be1": 0.1 * jax.random.normal(keys[9], (cout,), jnp.float32),
        "g2": 1.0 + 0.1 * jax.random.normal(keys[10], (cout,), jnp.float32),
        "be2": 0.1 * jax.random.normal(keys[11], (cout,), jnp.float32),
    }


if __name__ == "__main__":
    key = jax.random.PRNGKey(0)
    k_x, k_p = jax.random.split(key)

    N, Cin, Cout, H, W = 2, 4, 8, 16, 16
    x = jax.random.normal(k_x, (N, Cin, H, W), jnp.float32)   # NCHW input
    params = init_params(k_p, Cin, Cout)

    # one-time parameter packing (hoisted out of the per-call path)
    wslab, bn = prepare_params(params, W)

    out = jax.block_until_ready(residual_block2_forward(x, wslab, bn))
    ref = jax.block_until_ready(residual_block2_reference(x, params))

    assert out.shape == (N, Cout, H, W), out.shape
    if not np.allclose(np.asarray(out), np.asarray(ref), rtol=3e-2, atol=3e-2):
        max_err = float(np.max(np.abs(np.asarray(out) - np.asarray(ref))))
        raise AssertionError(f"Pallas output mismatch, max abs err = {max_err}")

    print("KERNEL_OK")
</pallas_src>

<mosaic_0001>
module attributes {stable_mosaic.version = 11 : i64} {
  func.func @_residual_block_kernel(%arg0: i32, %arg1: memref<2x18x64xbf16, #tpu.memory_space<vmem>>, %arg2: memref<3x192x256xbf16, #tpu.memory_space<vmem>>, %arg3: memref<4x256xf32, #tpu.memory_space<vmem>>, %arg4: memref<32x128xf32, #tpu.memory_space<vmem>>, %arg5: memref<2x18x128xbf16, #tpu.memory_space<vmem>>) attributes {dimension_semantics = [#tpu.dimension_semantics<arbitrary>], iteration_bounds = array<i64: 1>, scalar_prefetch = 0 : i64, scratch_operands = 1 : i64, tpu.core_type = #tpu.core_type<tc>, window_params = [{pipeline_mode = #tpu.pipeline_mode<synchronous>, transform_indices = @transform_0, window_bounds = array<i64: 2, 18, 64>}, {pipeline_mode = #tpu.pipeline_mode<synchronous>, transform_indices = @transform_1, window_bounds = array<i64: 3, 192, 256>}, {pipeline_mode = #tpu.pipeline_mode<synchronous>, transform_indices = @transform_2, window_bounds = array<i64: 4, 256>}, {pipeline_mode = #tpu.pipeline_mode<synchronous>, transform_indices = @transform_3, window_bounds = array<i64: 32, 128>}]} {
    %0 = tpu.iota {dimensions = array<i32: 0>} : vector<128x128xi32>
    %1 = tpu.iota {dimensions = array<i32: 1>} : vector<128x128xi32>
    %c7_i32 = arith.constant 7 : i32
    %2 = vector.broadcast %c7_i32 : i32 to vector<128x128xi32>
    %3 = arith.andi %0, %2 : vector<128x128xi32>
    %c7_i32_0 = arith.constant 7 : i32
    %4 = vector.broadcast %c7_i32_0 : i32 to vector<128x128xi32>
    %5 = arith.andi %1, %4 : vector<128x128xi32>
    %6 = arith.cmpi eq, %3, %5 : vector<128x128xi32>
    %7 = arith.extui %6 : vector<128x128xi1> to vector<128x128xi32>
    %8 = arith.sitofp %7 : vector<128x128xi32> to vector<128x128xf32>
    %c0 = arith.constant 0 : index
    %c0_1 = arith.constant 0 : index
    %c0_2 = arith.constant 0 : index
    %9 = vector.load %arg1[%c0, %c0_1, %c0_2] : memref<2x18x64xbf16, #tpu.memory_space<vmem>>, vector<2x18x64xbf16>
    %cst = arith.constant 0.000000e+00 : f32
    %10 = vector.broadcast %cst : f32 to vector<32x256xf32>
    %11 = vector.extract_strided_slice %9 {offsets = [0, 0, 0], sizes = [2, 16, 64], strides = [1, 1, 1]} : vector<2x18x64xbf16> to vector<2x16x64xbf16>
    %12 = vector.shape_cast %11 : vector<2x16x64xbf16> to vector<32x64xbf16>
    %c0_3 = arith.constant 0 : index
    %c0_4 = arith.constant 0 : index
    %c0_5 = arith.constant 0 : index
    %13 = vector.load %arg2[%c0_3, %c0_4, %c0_5] : memref<3x192x256xbf16, #tpu.memory_space<vmem>>, vector<1x64x256xbf16>
    %14 = vector.shape_cast %13 : vector<1x64x256xbf16> to vector<64x256xbf16>
    %cst_6 = arith.constant dense<0.000000e+00> : vector<32x256xf32>
    %15 = tpu.matmul %12, %14, %cst_6 {dimension_numbers = #tpu.dot_dimension_numbers<[1], [0], [0], [1], [0, 0, 1, 1], [], []>} : vector<32x64xbf16>, vector<64x256xbf16>, vector<32x256xf32> -> vector<32x256xf32>
    %16 = arith.addf %10, %15 : vector<32x256xf32>
    %17 = vector.extract_strided_slice %9 {offsets = [0, 1, 0], sizes = [2, 16, 64], strides = [1, 1, 1]} : vector<2x18x64xbf16> to vector<2x16x64xbf16>
    %18 = vector.shape_cast %17 : vector<2x16x64xbf16> to vector<32x64xbf16>
    %c1 = arith.constant 1 : index
    %c0_7 = arith.constant 0 : index
    %c0_8 = arith.constant 0 : index
    %19 = vector.load %arg2[%c1, %c0_7, %c0_8] : memref<3x192x256xbf16, #tpu.memory_space<vmem>>, vector<1x64x256xbf16>
    %20 = vector.shape_cast %19 : vector<1x64x256xbf16> to vector<64x256xbf16>
    %cst_9 = arith.constant dense<0.000000e+00> : vector<32x256xf32>
    %21 = tpu.matmul %18, %20, %cst_9 {dimension_numbers = #tpu.dot_dimension_numbers<[1], [0], [0], [1], [0, 0, 1, 1], [], []>} : vector<32x64xbf16>, vector<64x256xbf16>, vector<32x256xf32> -> vector<32x256xf32>
    %22 = arith.addf %16, %21 : vector<32x256xf32>
    %23 = vector.extract_strided_slice %9 {offsets = [0, 2, 0], sizes = [2, 16, 64], strides = [1, 1, 1]} : vector<2x18x64xbf16> to vector<2x16x64xbf16>
    %24 = vector.shape_cast %23 : vector<2x16x64xbf16> to vector<32x64xbf16>
    %c2 = arith.constant 2 : index
    %c0_10 = arith.constant 0 : index
    %c0_11 = arith.constant 0 : index
    %25 = vector.load %arg2[%c2, %c0_10, %c0_11] : memref<3x192x256xbf16, #tpu.memory_space<vmem>>, vector<1x64x256xbf16>
    %26 = vector.shape_cast %25 : vector<1x64x256xbf16> to vector<64x256xbf16>
    %cst_12 = arith.constant dense<0.000000e+00> : vector<32x256xf32>
    %27 = tpu.matmul %24, %26, %cst_12 {dimension_numbers = #tpu.dot_dimension_numbers<[1], [0], [0], [1], [0, 0, 1, 1], [], []>} : vector<32x64xbf16>, vector<64x256xbf16>, vector<32x256xf32> -> vector<32x256xf32>
    %28 = arith.addf %22, %27 : vector<32x256xf32>
    %29 = vector.extract_strided_slice %28 {offsets = [0, 0], sizes = [32, 128], strides = [1, 1]} : vector<32x256xf32> to vector<32x128xf32>
    %c0_13 = arith.constant 0 : index
    %c0_14 = arith.constant 0 : index
    %30 = vector.load %arg3[%c0_13, %c0_14] : memref<4x256xf32, #tpu.memory_space<vmem>>, vector<1x128xf32>
    %c1_15 = arith.constant 1 : index
    %c0_16 = arith.constant 0 : index
    %31 = vector.load %arg3[%c1_15, %c0_16] : memref<4x256xf32, #tpu.memory_space<vmem>>, vector<1x128xf32>
    %cst_17 = arith.constant dense<0.000000e+00> : vector<128xf32>
    %32 = vector.multi_reduction <add>, %29, %cst_17 [0] : vector<32x128xf32> to vector<128xf32>
    %33 = vector.shape_cast %32 : vector<128xf32> to vector<1x128xf32>
    %cst_18 = arith.constant dense<0.000000e+00> : vector<1x128xf32>
    %34 = tpu.matmul %33, %8, %cst_18 {dimension_numbers = #tpu.dot_dimension_numbers<[1], [0], [0], [1], [0, 0, 1, 1], [], []>} : vector<1x128xf32>, vector<128x128xf32>, vector<1x128xf32> -> vector<1x128xf32>
    %cst_19 = arith.constant 0.001953125 : f32
    %35 = vector.broadcast %cst_19 : f32 to vector<1x128xf32>
    %36 = arith.mulf %34, %35 : vector<1x128xf32>
    %37 = vector.broadcast %36 : vector<1x128xf32> to vector<32x128xf32>
    %38 = arith.subf %29, %37 : vector<32x128xf32>
    %39 = arith.mulf %38, %38 : vector<32x128xf32>
    %cst_20 = arith.constant dense<0.000000e+00> : vector<128xf32>
    %40 = vector.multi_reduction <add>, %39, %cst_20 [0] : vector<32x128xf32> to vector<128xf32>
    %41 = vector.shape_cast %40 : vector<128xf32> to vector<1x128xf32>
    %cst_21 = arith.constant dense<0.000000e+00> : vector<1x128xf32>
    %42 = tpu.matmul %41, %8, %cst_21 {dimension_numbers = #tpu.dot_dimension_numbers<[1], [0], [0], [1], [0, 0, 1, 1], [], []>} : vector<1x128xf32>, vector<128x128xf32>, vector<1x128xf32> -> vector<1x128xf32>
    %cst_22 = arith.constant 0.001953125 : f32
    %43 = vector.broadcast %cst_22 : f32 to vector<1x128xf32>
    %44 = arith.mulf %42, %43 : vector<1x128xf32>
    %cst_23 = arith.constant 9.99999974E-6 : f32
    %45 = vector.broadcast %cst_23 : f32 to vector<1x128xf32>
    %46 = arith.addf %44, %45 : vector<1x128xf32>
    %47 = math.rsqrt %46 : vector<1x128xf32>
    %48 = arith.mulf %30, %47 : vector<1x128xf32>
    %49 = vector.broadcast %48 : vector<1x128xf32> to vector<32x128xf32>
    %50 = arith.mulf %38, %49 : vector<32x128xf32>
    %51 = vector.broadcast %31 : vector<1x128xf32> to vector<32x128xf32>
    %52 = arith.addf %50, %51 : vector<32x128xf32>
    %53 = vector.extract_strided_slice %28 {offsets = [0, 128], sizes = [32, 128], strides = [1, 1]} : vector<32x256xf32> to vector<32x128xf32>
    %c0_24 = arith.constant 0 : index
    %c128 = arith.constant 128 : index
    %54 = vector.load %arg3[%c0_24, %c128] : memref<4x256xf32, #tpu.memory_space<vmem>>, vector<1x128xf32>
    %c1_25 = arith.constant 1 : index
    %c128_26 = arith.constant 128 : index
    %55 = vector.load %arg3[%c1_25, %c128_26] : memref<4x256xf32, #tpu.memory_space<vmem>>, vector<1x128xf32>
    %cst_27 = arith.constant dense<0.000000e+00> : vector<128xf32>
    %56 = vector.multi_reduction <add>, %53, %cst_27 [0] : vector<32x128xf32> to vector<128xf32>
    %57 = vector.shape_cast %56 : vector<128xf32> to vector<1x128xf32>
    %cst_28 = arith.constant dense<0.000000e+00> : vector<1x128xf32>
    %58 = tpu.matmul %57, %8, %cst_28 {dimension_numbers = #tpu.dot_dimension_numbers<[1], [0], [0], [1], [0, 0, 1, 1], [], []>} : vector<1x128xf32>, vector<128x128xf32>, vector<1x128xf32> -> vector<1x128xf32>
    %cst_29 = arith.constant 0.001953125 : f32
    %59 = vector.broadcast %cst_29 : f32 to vector<1x128xf32>
    %60 = arith.mulf %58, %59 : vector<1x128xf32>
    %61 = vector.broadcast %60 : vector<1x128xf32> to vector<32x128xf32>
    %62 = arith.subf %53, %61 : vector<32x128xf32>
    %63 = arith.mulf %62, %62 : vector<32x128xf32>
    %cst_30 = arith.constant dense<0.000000e+00> : vector<128xf32>
    %64 = vector.multi_reduction <add>, %63, %cst_30 [0] : vector<32x128xf32> to vector<128xf32>
    %65 = vector.shape_cast %64 : vector<128xf32> to vector<1x128xf32>
    %cst_31 = arith.constant dense<0.000000e+00> : vector<1x128xf32>
    %66 = tpu.matmul %65, %8, %cst_31 {dimension_numbers = #tpu.dot_dimension_numbers<[1], [0], [0], [1], [0, 0, 1, 1], [], []>} : vector<1x128xf32>, vector<128x128xf32>, vector<1x128xf32> -> vector<1x128xf32>
    %cst_32 = arith.constant 0.001953125 : f32
    %67 = vector.broadcast %cst_32 : f32 to vector<1x128xf32>
    %68 = arith.mulf %66, %67 : vector<1x128xf32>
    %cst_33 = arith.constant 9.99999974E-6 : f32
    %69 = vector.broadcast %cst_33 : f32 to vector<1x128xf32>
    %70 = arith.addf %68, %69 : vector<1x128xf32>
    %71 = math.rsqrt %70 : vector<1x128xf32>
    %72 = arith.mulf %54, %71 : vector<1x128xf32>
    %73 = vector.broadcast %72 : vector<1x128xf32> to vector<32x128xf32>
    %74 = arith.mulf %62, %73 : vector<32x128xf32>
    %75 = vector.broadcast %55 : vector<1x128xf32> to vector<32x128xf32>
    %76 = arith.addf %74, %75 : vector<32x128xf32>
    %cst_34 = arith.constant 0.000000e+00 : f32
    %77 = vector.broadcast %cst_34 : f32 to vector<32x128xf32>
    %78 = arith.cmpf ogt, %76, %77 : vector<32x128xf32>
    %cst_35 = arith.constant 2.000000e-01 : f32
    %79 = vector.broadcast %cst_35 : f32 to vector<32x128xf32>
    %80 = arith.mulf %79, %76 : vector<32x128xf32>
    %81 = arith.select %78, %76, %80 : vector<32x128xi1>, vector<32x128xf32>
    %cst_36 = arith.constant 0.000000e+00 : bf16
    %82 = vector.broadcast %cst_36 : bf16 to vector<2x1x128xbf16>
    %c0_37 = arith.constant 0 : index
    %c0_38 = arith.constant 0 : index
    %c0_39 = arith.constant 0 : index
    %83 = vector.load %arg5[%c0_37, %c0_38, %c0_39] : memref<2x18x128xbf16, #tpu.memory_space<vmem>>, vector<2x1x128xbf16>
    tpu.vector_store %arg5[%c0_37, %c0_38, %c0_39], %82 {strides = array<i32>} : memref<2x18x128xbf16, #tpu.memory_space<vmem>>, vector<2x1x128xbf16>,
    %c0_40 = arith.constant 0 : index
    %c17 = arith.constant 17 : index
    %c0_41 = arith.constant 0 : index
    %84 = vector.load %arg5[%c0_40, %c17, %c0_41] : memref<2x18x128xbf16, #tpu.memory_space<vmem>>, vector<2x1x128xbf16>
    tpu.vector_store %arg5[%c0_40, %c17, %c0_41], %82 {strides = array<i32>} : memref<2x18x128xbf16, #tpu.memory_space<vmem>>, vector<2x1x128xbf16>,
    %85 = vector.shape_cast %81 : vector<32x128xf32> to vector<2x16x128xf32>
    %86 = arith.truncf %85 : vector<2x16x128xf32> to vector<2x16x128xbf16>
    %c0_42 = arith.constant 0 : index
    %c1_43 = arith.constant 1 : index
    %c0_44 = arith.constant 0 : index
    %87 = vector.load %arg5[%c0_42, %c1_43, %c0_44] : memref<2x18x128xbf16, #tpu.memory_space<vmem>>, vector<2x16x128xbf16>
    tpu.vector_store %arg5[%c0_42, %c1_43, %c0_44], %86 {strides = array<i32>} : memref<2x18x128xbf16, #tpu.memory_space<vmem>>, vector<2x16x128xbf16>,
    %c0_45 = arith.constant 0 : index
    %c0_46 = arith.constant 0 : index
    %c0_47 = arith.constant 0 : index
    %88 = vector.load %arg5[%c0_45, %c0_46, %c0_47] : memref<2x18x128xbf16, #tpu.memory_space<vmem>>, vector<2x18x128xbf16>
    %cst_48 = arith.constant 0.000000e+00 : f32
    %89 = vector.broadcast %cst_48 : f32 to vector<32x128xf32>
    %90 = vector.extract_strided_slice %88 {offsets = [0, 0, 0], sizes = [2, 16, 128], strides = [1, 1, 1]} : vector<2x18x128xbf16> to vector<2x16x128xbf16>
    %91 = vector.shape_cast %90 : vector<2x16x128xbf16> to vector<32x128xbf16>
    %c0_49 = arith.constant 0 : index
    %c64 = arith.constant 64 : index
    %c0_50 = arith.constant 0 : index
    %92 = vector.load %arg2[%c0_49, %c64, %c0_50] : memref<3x192x256xbf16, #tpu.memory_space<vmem>>, vector<1x128x128xbf16>
    %93 = vector.shape_cast %92 : vector<1x128x128xbf16> to vector<128x128xbf16>
    %cst_51 = arith.constant dense<0.000000e+00> : vector<32x128xf32>
    %94 = tpu.matmul %91, %93, %cst_51 {dimension_numbers = #tpu.dot_dimension_numbers<[1], [0], [0], [1], [0, 0, 1, 1], [], []>} : vector<32x128xbf16>, vector<128x128xbf16>, vector<32x128xf32> -> vector<32x128xf32>
    %95 = arith.addf %89, %94 : vector<32x128xf32>
    %96 = vector.extract_strided_slice %88 {offsets = [0, 1, 0], sizes = [2, 16, 128], strides = [1, 1, 1]} : vector<2x18x128xbf16> to vector<2x16x128xbf16>
    %97 = vector.shape_cast %96 : vector<2x16x128xbf16> to vector<32x128xbf16>
    %c1_52 = arith.constant 1 : index
    %c64_53 = arith.constant 64 : index
    %c0_54 = arith.constant 0 : index
    %98 = vector.load %arg2[%c1_52, %c64_53, %c0_54] : memref<3x192x256xbf16, #tpu.memory_space<vmem>>, vector<1x128x128xbf16>
    %99 = vector.shape_cast %98 : vector<1x128x128xbf16> to vector<128x128xbf16>
    %cst_55 = arith.constant dense<0.000000e+00> : vector<32x128xf32>
    %100 = tpu.matmul %97, %99, %cst_55 {dimension_numbers = #tpu.dot_dimension_numbers<[1], [0], [0], [1], [0, 0, 1, 1], [], []>} : vector<32x128xbf16>, vector<128x128xbf16>, vector<32x128xf32> -> vector<32x128xf32>
    %101 = arith.addf %95, %100 : vector<32x128xf32>
    %102 = vector.extract_strided_slice %88 {offsets = [0, 2, 0], sizes = [2, 16, 128], strides = [1, 1, 1]} : vector<2x18x128xbf16> to vector<2x16x128xbf16>
    %103 = vector.shape_cast %102 : vector<2x16x128xbf16> to vector<32x128xbf16>
    %c2_56 = arith.constant 2 : index
    %c64_57 = arith.constant 64 : index
    %c0_58 = arith.constant 0 : index
    %104 = vector.load %arg2[%c2_56, %c64_57, %c0_58] : memref<3x192x256xbf16, #tpu.memory_space<vmem>>, vector<1x128x128xbf16>
    %105 = vector.shape_cast %104 : vector<1x128x128xbf16> to vector<128x128xbf16>
    %cst_59 = arith.constant dense<0.000000e+00> : vector<32x128xf32>
    %106 = tpu.matmul %103, %105, %cst_59 {dimension_numbers = #tpu.dot_dimension_numbers<[1], [0], [0], [1], [0, 0, 1, 1], [], []>} : vector<32x128xbf16>, vector<128x128xbf16>, vector<32x128xf32> -> vector<32x128xf32>
    %107 = arith.addf %101, %106 : vector<32x128xf32>
    %c2_60 = arith.constant 2 : index
    %c0_61 = arith.constant 0 : index
    %108 = vector.load %arg3[%c2_60, %c0_61] : memref<4x256xf32, #tpu.memory_space<vmem>>, vector<1x128xf32>
    %c3 = arith.constant 3 : index
    %c0_62 = arith.constant 0 : index
    %109 = vector.load %arg3[%c3, %c0_62] : memref<4x256xf32, #tpu.memory_space<vmem>>, vector<1x128xf32>
    %cst_63 = arith.constant dense<0.000000e+00> : vector<128xf32>
    %110 = vector.multi_reduction <add>, %107, %cst_63 [0] : vector<32x128xf32> to vector<128xf32>
    %111 = vector.shape_cast %110 : vector<128xf32> to vector<1x128xf32>
    %cst_64 = arith.constant dense<0.000000e+00> : vector<1x128xf32>
    %112 = tpu.matmul %111, %8, %cst_64 {dimension_numbers = #tpu.dot_dimension_numbers<[1], [0], [0], [1], [0, 0, 1, 1], [], []>} : vector<1x128xf32>, vector<128x128xf32>, vector<1x128xf32> -> vector<1x128xf32>
    %cst_65 = arith.constant 0.001953125 : f32
    %113 = vector.broadcast %cst_65 : f32 to vector<1x128xf32>
    %114 = arith.mulf %112, %113 : vector<1x128xf32>
    %115 = vector.broadcast %114 : vector<1x128xf32> to vector<32x128xf32>
    %116 = arith.subf %107, %115 : vector<32x128xf32>
    %117 = arith.mulf %116, %116 : vector<32x128xf32>
    %cst_66 = arith.constant dense<0.000000e+00> : vector<128xf32>
    %118 = vector.multi_reduction <add>, %117, %cst_66 [0] : vector<32x128xf32> to vector<128xf32>
    %119 = vector.shape_cast %118 : vector<128xf32> to vector<1x128xf32>
    %cst_67 = arith.constant dense<0.000000e+00> : vector<1x128xf32>
    %120 = tpu.matmul %119, %8, %cst_67 {dimension_numbers = #tpu.dot_dimension_numbers<[1], [0], [0], [1], [0, 0, 1, 1], [], []>} : vector<1x128xf32>, vector<128x128xf32>, vector<1x128xf32> -> vector<1x128xf32>
    %cst_68 = arith.constant 0.001953125 : f32
    %121 = vector.broadcast %cst_68 : f32 to vector<1x128xf32>
    %122 = arith.mulf %120, %121 : vector<1x128xf32>
    %cst_69 = arith.constant 9.99999974E-6 : f32
    %123 = vector.broadcast %cst_69 : f32 to vector<1x128xf32>
    %124 = arith.addf %122, %123 : vector<1x128xf32>
    %125 = math.rsqrt %124 : vector<1x128xf32>
    %126 = arith.mulf %108, %125 : vector<1x128xf32>
    %127 = vector.broadcast %126 : vector<1x128xf32> to vector<32x128xf32>
    %128 = arith.mulf %116, %127 : vector<32x128xf32>
    %129 = vector.broadcast %109 : vector<1x128xf32> to vector<32x128xf32>
    %130 = arith.addf %128, %129 : vector<32x128xf32>
    %131 = arith.addf %130, %52 : vector<32x128xf32>
    %cst_70 = arith.constant 0.000000e+00 : f32
    %132 = vector.broadcast %cst_70 : f32 to vector<32x128xf32>
    %133 = arith.cmpf ogt, %131, %132 : vector<32x128xf32>
    %cst_71 = arith.constant 2.000000e-01 : f32
    %134 = vector.broadcast %cst_71 : f32 to vector<32x128xf32>
    %135 = arith.mulf %134, %131 : vector<32x128xf32>
    %136 = arith.select %133, %131, %135 : vector<32x128xi1>, vector<32x128xf32>
    %c0_72 = arith.constant 0 : index
    %c0_73 = arith.constant 0 : index
    %137 = vector.load %arg4[%c0_72, %c0_73] : memref<32x128xf32, #tpu.memory_space<vmem>>, vector<32x128xf32>
    tpu.vector_store %arg4[%c0_72, %c0_73], %136 {strides = array<i32>} : memref<32x128xf32, #tpu.memory_space<vmem>>, vector<32x128xf32>,
    return
  }
  func.func @transform_0(%arg0: i32) -> (i32, i32, i32) {
    %c0_i32 = arith.constant 0 : i32
    %c0_i32_0 = arith.constant 0 : i32
    %c0_i32_1 = arith.constant 0 : i32
    %c0_i32_2 = arith.constant 0 : i32
    return %c0_i32, %c0_i32_0, %c0_i32_1 : i32, i32, i32
  }
  func.func @transform_1(%arg0: i32) -> (i32, i32, i32) {
    %c0_i32 = arith.constant 0 : i32
    %c0_i32_0 = arith.constant 0 : i32
    %c0_i32_1 = arith.constant 0 : i32
    %c0_i32_2 = arith.constant 0 : i32
    return %c0_i32, %c0_i32_0, %c0_i32_1 : i32, i32, i32
  }
  func.func @transform_2(%arg0: i32) -> (i32, i32) {
    %c0_i32 = arith.constant 0 : i32
    %c0_i32_0 = arith.constant 0 : i32
    %c0_i32_1 = arith.constant 0 : i32
    return %c0_i32, %c0_i32_0 : i32, i32
  }
  func.func @transform_3(%arg0: i32) -> (i32, i32) {
    %c0_i32 = arith.constant 0 : i32
    %c0_i32_0 = arith.constant 0 : i32
    %c0_i32_1 = arith.constant 0 : i32
    return %c0_i32, %c0_i32_0 : i32, i32
  }
}

</mosaic_0001>

<bundles_post_ra>
// kernel: residual_block2_forward.1
= control target key start
LH: loop header
LB: loop body
LE: loop exit
PB: predicated region body
PF: predicated region fallthrough
CT: control target
= control target key end

     0   :  { %8 = vsyncpa [#allocation4], 0  ;;  %s1677_s15 = smov [#allocation3]   ;;  %s1678_s17 = smov 128   ;;  %s2336_s0 = inlined_call_operand.vmem [shape: bf16[2,18,64], index: 0, kind: input, shape index: {}]   ;;  %s2337_s1 = inlined_call_operand.hbm [shape: bf16[3,192,256], index: 1, kind: input, shape index: {}]   ;;  %s2338_s2 = inlined_call_operand.vmem [shape: f32[4,256], index: 2, kind: input, shape index: {}]   ;;  %s2339_s3 = inlined_call_operand.vmem [shape: f32[32,128], index: 3, kind: output, shape index: {}]  }
   0x1   :  { %s15_s14 = sshll.u32 %s2337_s1, 4  ;;  %s17_s16 = sshll.u32 %s1677_s15, 4  ;;  %s16_s14 = int_to_ptr.hbm [resolvable:$true] %s15_s14  ;;  %s18_s16 = int_to_ptr.vmem [resolvable:$true] %s17_s16 }
   0x2   :  { %s1679_s18 = smov 8  }
   0x3   :  { %23 = dma.hbm_to_vmem [thread:$0]  %s16_s14, 9216, %s18_s16, [#allocation4], %s1678_s17, %s1678_s17, %s1679_s18  }
   0x4   :  { %1675 = dma.done.wait [#allocation4], 9216  }
   0x5   :  { %1676 = vsyncadd [#allocation4], 4294958080  ;;  %v1288_v0 = vld [vmem:[#allocation3 + $0xf0] sm:$0xf]  ;;  %v1599_v1 = vld [vmem:[#allocation3 + $0xf4] sm:$0xf0] }
   0x6   :  { %v1598_v2 = vld [vmem:[#allocation3 + $0xf4] sm:$0xf]  ;;  %v1289_v3 = vor.u32 %v1599_v1, %v1288_v0  ;;  %v1290_v4 = vld [vmem:[#allocation3 + $0xf8] sm:$0xf0]  ;;  %v1332_v5 = vld [vmem:[#allocation3 + $0x30] sm:$0xf] }
   0x7   :  { %v1591_v6 = vld [vmem:[#allocation3 + $0x34] sm:$0xf0]  ;;  %v1293_v7 = vor.u32 %v1598_v2, %v1290_v4  ;;  %v1280_v9 = vld [vmem:[#allocation3 + $0xe0] sm:$0xf]  ;;  %v1597_v10 = vld [vmem:[#allocation3 + $0xe4] sm:$0xf0] }
   0x8   :  { %v1333_v8 = vor.u32 %v1591_v6, %v1332_v5  ;;  %v1596_v11 = vld [vmem:[#allocation3 + $0xe4] sm:$0xf]  ;;  %246 = vmatpush.bf16.msra.mxu0 %v1289_v3  ;;  %1634 = vmatpush.bf16.msra.mxu3 %v1289_v3  ;;  %v1281_v12 = vor.u32 %v1597_v10, %v1280_v9  ;;  %v1282_v13 = vld [vmem:[#allocation3 + $0xe8] sm:$0xf0]  ;;  %v1324_v14 = vld [vmem:[#allocation3 + $0x20] sm:$0xf] }
   0x9   :  { %v1589_v15 = vld [vmem:[#allocation3 + $0x24] sm:$0xf0]  ;;  %vm129_vm0 = vsmask.f32 3328  ;;  %vm130_vm1 = vsmask.f32 7440  ;;  %265 = vmatpush.bf16.msra.mxu1 %v1293_v7  ;;  %v1285_v16 = vor.u32 %v1596_v11, %v1282_v13 }
   0xa   :  { %340 = vmatpush.bf16.msra.mxu2 %v1333_v8  ;;  %v1325_v17 = vor.u32 %v1589_v15, %v1324_v14  ;;  %v1272_v18 = vld [vmem:[#allocation3 + $0xd0] sm:$0xf]  ;;  %v1595_v19 = vld [vmem:[#allocation3 + $0xd4] sm:$0xf0]  ;;  %v1594_v20 = vld [vmem:[#allocation3 + $0xd4] sm:$0xf] }
   0xb   :  { %v1274_v21 = vld [vmem:[#allocation3 + $0xd8] sm:$0xf0]  ;;  %v1316_v22 = vld [vmem:[#allocation3 + $0x10] sm:$0xf]  ;;  %v1587_v23 = vld [vmem:[#allocation3 + $0x14] sm:$0xf0]  ;;  %v1273_v27 = vor.u32 %v1595_v19, %v1272_v18 }
   0xc   :  { %v1264_v24 = vld [vmem:[#allocation3 + $0xc0] sm:$0xf]  ;;  %v1593_v25 = vld [vmem:[#allocation3 + $0xc4] sm:$0xf0]  ;;  %v1592_v26 = vld [vmem:[#allocation3 + $0xc4] sm:$0xf]  ;;  %247 = vmatpush.bf16.msra.mxu0 %v1281_v12  ;;  %1635 = vmatpush.bf16.msra.mxu3 %v1281_v12  ;;  %v1277_v31 = vor.u32 %v1594_v20, %v1274_v21  ;;  %v1317_v32 = vor.u32 %v1587_v23, %v1316_v22 }
   0xd   :  { %v1266_v28 = vld [vmem:[#allocation3 + $0xc8] sm:$0xf0]  ;;  %v1308_v29 = vld [vmem:[#allocation3] sm:$0xf]  ;;  %v1585_v30 = vld [vmem:[#allocation3 + $0x4] sm:$0xf0]  ;;  %266 = vmatpush.bf16.msra.mxu1 %v1285_v16  ;;  %v1265_v41 = vor.u32 %v1593_v25, %v1264_v24 }
   0xe   :  { %341 = vmatpush.bf16.msra.mxu2 %v1325_v17  ;;  %v1707_v33 = vld [vmem:[%s2336_s0] sm:$0xf]  ;;  %v1712_v34 = vld [vmem:[%s2336_s0 + $0x4] sm:$0xf]  ;;  %v1717_v35 = vld [vmem:[%s2336_s0 + $0x8] sm:$0x1]  ;;  %v1269_v42 = vor.u32 %v1592_v26, %v1266_v28  ;;  %v1309_v43 = vor.u32 %v1585_v30, %v1308_v29 }
   0xf   :  { %vm235_vm2 = vcmask 523264   ;;  %v133_v36 = vshrl.u32 %v1707_v33, 16  ;;  %v136_v37 = vshll.u32 %v1707_v33, 16  ;;  %v142_v38 = vshll.u32 %v1712_v34, 16  ;;  %v1726_v40 = vld [vmem:[%s2336_s0 + $0xc] sm:$0xf]  ;;  %vm1746_vm3 = vmor %vm129_vm0, %vm130_vm1 }
  0x10   :  { %v146_v39 = vshrl.u32 %v1712_v34, 16  ;;  %v152_v44 = vshll.u32 %v1717_v35, 16  ;;  %v1732_v45 = vld [vmem:[%s2336_s0 + $0x10] sm:$0xf]  ;;  %v1737_v46 = vld [vmem:[%s2336_s0 + $0x14] sm:$0x1]  ;;  %248 = vmatpush.bf16.msra.mxu0 %v1273_v27  ;;  %1636 = vmatpush.bf16.msra.mxu3 %v1273_v27 }
  0x11   :  { %v135_v47 = vrot.slane %v133_v36, 4  ;;  %v138_v48 = vrot.slane %v136_v37, 5  ;;  %v144_v49 = vrot.slane %v142_v38, 5  ;;  %267 = vmatpush.bf16.msra.mxu1 %v1277_v31  ;;  %v157_v52 = vshrl.u32 %v1726_v40, 16  ;;  %v1606_v55 = vld [vmem:[#allocation3 + $0x1b4] sm:$0xf] }
  0x12   :  { %v148_v50 = vrot.slane %v146_v39, 4  ;;  %342 = vmatpush.bf16.msra.mxu2 %v1317_v32  ;;  %v154_v51 = vrot.slane %v152_v44, 5  ;;  %v160_v53 = vshll.u32 %v1726_v40, 16  ;;  %v166_v54 = vshll.u32 %v1732_v45, 16  ;;  %v1372_v60 = vld [vmem:[#allocation3 + $0x1b8] sm:$0xf0] }
  0x13   :  { %v139_v56 = vor.u32 %v138_v48, %v135_v47  ;;  %v170_v58 = vshrl.u32 %v1732_v45, 16  ;;  %v176_v59 = vshll.u32 %v1737_v46, 16  ;;  %v1590_v61 = vld [vmem:[#allocation3 + $0x34] sm:$0xf]  ;;  %v2355_v62 = vmov 0  ;;  %v1753_v2 = vld [vmem:[%s2336_s0] sm:$0xff] }
  0x14   :  { %v149_v57 = vor.u32 %v148_v50, %v144_v49  ;;  %v2356_v62 = vsel %vm1746_vm3, 4294967295, %v2355_v62  ;;  %v159_v63 = vrot.slane %v157_v52, 4  ;;  %v162_v0 = vrot.slane %v160_v53, 5  ;;  %v1334_v4 = vld [vmem:[#allocation3 + $0x38] sm:$0xf0]  ;;  %249 = vmatpush.bf16.msra.mxu0 %v1265_v41  ;;  %1637 = vmatpush.bf16.msra.mxu3 %v1265_v41 }
  0x15   :  { %v168_v1 = vrot.slane %v166_v54, 5  ;;  %v1375_v3 = vor.u32 %v1606_v55, %v1372_v60  ;;  %v140_v5 = vrot.slane %v139_v56, 4  ;;  %v172_v7 = vrot.slane %v170_v58, 4  ;;  %v1370_v9 = vld [vmem:[#allocation3 + $0x1b0] sm:$0xf]  ;;  %268 = vmatpush.bf16.msra.mxu1 %v1269_v42 }
  0x16   :  { %v150_v6 = vrot.slane %v149_v57, 4  ;;  %v178_v8 = vrot.slane %v176_v59, 5  ;;  %343 = vmatpush.bf16.msra.mxu2 %v1309_v43  ;;  %v163_v10 = vor.u32 %v162_v0, %v159_v63  ;;  %v1337_v11 = vor.u32 %v1590_v61, %v1334_v4  ;;  %v1607_v12 = vld [vmem:[#allocation3 + $0x1b4] sm:$0xf0]  ;;  %v1588_v13 = vld [vmem:[#allocation3 + $0x24] sm:$0xf] }
  0x17   :  { %v1326_v14 = vld [vmem:[#allocation3 + $0x28] sm:$0xf0]  ;;  %v145_v15 = vsel %vm1746_vm3, %v140_v5, %v144_v49  ;;  %v173_v17 = vor.u32 %v172_v7, %v168_v1  ;;  %v1371_v18 = vor.u32 %v1607_v12, %v1370_v9  ;;  %v1362_v19 = vld [vmem:[#allocation3 + $0x1a0] sm:$0xf]  ;;  %v1605_v20 = vld [vmem:[#allocation3 + $0x1a4] sm:$0xf0] }
  0x18   :  { %v155_v16 = vsel %vm1746_vm3, %v150_v6, %v154_v51  ;;  %v1604_v21 = vld [vmem:[#allocation3 + $0x1a4] sm:$0xf]  ;;  %v189_v22 = vunpack.c.l.b16 %v145_v15  ;;  %v164_v24 = vrot.slane %v163_v10, 4  ;;  %359 = vmatpush.bf16.msrb.mxu3 %v1337_v11  ;;  %v1364_v25 = vld [vmem:[#allocation3 + $0x1a8] sm:$0xf0]  ;;  %v1329_v27 = vor.u32 %v1588_v13, %v1326_v14  ;;  %v1583_v4 = vld [vmem:[%s2336_s0 + $0xc] sm:$0xff] }
  0x19   :  { %477 = vmatpush.bf16.msrb.mxu1 %v1375_v3  ;;  %v190_v23 = vunpack.c.l.b16 %v155_v16  ;;  %v174_v26 = vrot.slane %v173_v17, 4  ;;  %1338 = vmatmul.msk.bf16.vlgmr.msra.gmra.mxu2 %vm235_vm2, %v1753_v2  ;;  %v1363_v28 = vor.u32 %v1605_v20, %v1362_v19  ;;  %v1367_v29 = vor.u32 %v1604_v21, %v1364_v25  ;;  %v1586_v30 = vld [vmem:[#allocation3 + $0x14] sm:$0xf]  ;;  %v1318_v31 = vld [vmem:[#allocation3 + $0x18] sm:$0xf0] }
  0x1a   :  { %458 = vmatpush.bf16.msrb.mxu0 %v1371_v18  ;;  %v169_v36 = vsel %vm1746_vm3, %v164_v24, %v168_v1  ;;  %v1354_v37 = vld [vmem:[#allocation3 + $0x190] sm:$0xf]  ;;  %v1603_v38 = vld [vmem:[#allocation3 + $0x194] sm:$0xf0]  ;;  %vm376_vm4 = vcmask 1042432   ;;  %v384_v47 = vrot.slane %v1717_v35, 5  ;;  %v1321_v49 = vor.u32 %v1586_v30, %v1318_v31 }
  0x1b   :  { %v193_v32 = vpack.c.b16 %v190_v23, %v189_v22  ;;  %v179_v39 = vsel %vm1746_vm3, %v174_v26, %v178_v8  ;;  %v191_v41 = vunpack.c.l.b16 %v169_v36  ;;  %v1584_v42 = vld [vmem:[#allocation3 + $0x4] sm:$0xf]  ;;  %v1310_v43 = vld [vmem:[#allocation3 + $0x8] sm:$0xf0]  ;;  %v1602_v44 = vld [vmem:[#allocation3 + $0x194] sm:$0xf]  ;;  %v1355_v53 = vor.u32 %v1603_v38, %v1354_v37 }
  0x1c   :  { %v192_v48 = vunpack.c.l.b16 %v179_v39  ;;  %v1346_v50 = vld [vmem:[#allocation3 + $0x180] sm:$0xf]  ;;  %vm377_vm5 = vcmask 1046532   ;;  %v1356_v51 = vld [vmem:[#allocation3 + $0x198] sm:$0xf0]  ;;  %360 = vmatpush.bf16.msrb.mxu3 %v1329_v27  ;;  %v1342_v55 = vrot.slane %v1707_v33, 9  ;;  %v1313_v63 = vor.u32 %v1584_v42, %v1310_v43 }
  0x1d   :  { %478 = vmatpush.bf16.msrb.mxu1 %v1367_v29  ;;  %1294 = vmatmul.msk.bf16.vlgmr.msra.gmra.mxu0 %vm235_vm2, %v193_v32  ;;  %v1600_v52 = vld [vmem:[#allocation3 + $0x184] sm:$0xf]  ;;  %v1601_v54 = vld [vmem:[#allocation3 + $0x184] sm:$0xf0]  ;;  %v381_v56 = vrot.slane %v1712_v34, 5  ;;  %v1359_v57 = vor.u32 %v1602_v44, %v1356_v51  ;;  %vm1771_vm6 = vmor %vm376_vm4, %vm377_vm5  ;;  %v2357_v35 = vmov 0 }
  0x1e   :  { %1296 = vmatmul.msk.bf16.vlgmr.msra.gmra.mxu1 %vm235_vm2, %v193_v32  ;;  %459 = vmatpush.bf16.msrb.mxu0 %v1363_v28  ;;  %v1348_v58 = vld [vmem:[#allocation3 + $0x188] sm:$0xf0]  ;;  %v194_v59 = vpack.c.b16 %v192_v48, %v191_v41  ;;  %v2358_v35 = vsel %vm1771_vm6, 4294967295, %v2357_v35  ;;  %v1347_v0 = vor.u32 %v1601_v54, %v1346_v50  ;;  %v388_v6 = vrot.slane %v1732_v45, 5 }
  0x1f   :  { %v383_v60 = vrot.slane %v381_v56, 4  ;;  %v1351_v61 = vor.u32 %v1600_v52, %v1348_v58  ;;  %v382_v33 = vsel %vm1771_vm6, %v1342_v55, %v381_v56  ;;  %v1343_v7 = vrot.slane %v1726_v40, 9 }
  0x20   :  { %1295 = vmatmul.msk.bf16.vlgmr.msra.gmra.mxu3 %vm235_vm2, %v194_v59  ;;  %v402_v1 = vunpack.c.l.b16 %v382_v33  ;;  %v390_v8 = vrot.slane %v388_v6, 4  ;;  %v391_v9 = vrot.slane %v1737_v46, 5  ;;  %v31_v40 = vlaneseq }
  0x21   :  { %479 = vmatpush.bf16.msrb.mxu1 %v1359_v57  ;;  %361 = vmatpush.bf16.msrb.mxu3 %v1321_v49  ;;  %v385_v34 = vsel %vm1771_vm6, %v383_v60, %v384_v47  ;;  %v389_v10 = vsel %vm1771_vm6, %v1343_v7, %v388_v6  ;;  %v1680_v21 = vmov 1.0   ;;  %v2373_v52 = vmov 0 }
  0x22   :  { %460 = vmatpush.bf16.msrb.mxu0 %v1355_v53  ;;  %v403_v3 = vunpack.c.l.b16 %v385_v34  ;;  %v392_v11 = vsel %vm1771_vm6, %v390_v8, %v391_v9  ;;  %v404_v12 = vunpack.c.l.b16 %v389_v10  ;;  %v1799_v46 = vshrl.u32 %v31_v40, 7 }
  0x23   :  { %v405_v45 = vunpack.c.l.b16 %v392_v11  ;;  %v49_v14 = vand.u32 127, %v31_v40  ;;  %v2375_v55 = vmov 0  ;;  %v2379_v33 = vmov 0 }
  0x24   :  { %v406_v5 = vpack.c.b16 %v403_v3, %v402_v1  ;;  %v46_v17 = vadd.s32 112, %v1799_v46  ;;  %v45_v20 = vadd.s32 104, %v1799_v46  ;;  %v44_v24 = vadd.s32 96, %v1799_v46 }
  0x25   :  { %480 = vmatpush.bf16.msrb.mxu1 %v1351_v61  ;;  %362 = vmatpush.bf16.msrb.mxu3 %v1313_v63  ;;  %v407_v13 = vpack.c.b16 %v405_v45, %v404_v12  ;;  %v1802_v16 = vand.u32 7, %v49_v14  ;;  %v43_v29 = vadd.s32 88, %v1799_v46  ;;  %v42_v32 = vadd.s32 80, %v1799_v46 }
  0x26   :  { %461 = vmatpush.bf16.msrb.mxu0 %v1347_v0  ;;  %v64_v19 = vand.u32 7, %v46_v17  ;;  %v63_v23 = vand.u32 7, %v45_v20  ;;  %v62_v28 = vand.u32 7, %v44_v24  ;;  %v41_v39 = vadd.s32 72, %v1799_v46 }
  0x27   :  { %v61_v31 = vand.u32 7, %v43_v29  ;;  %v60_v38 = vand.u32 7, %v42_v32  ;;  %v40_v43 = vadd.s32 64, %v1799_v46  ;;  %v39_v50 = vadd.s32 56, %v1799_v46 }
  0x28   :  { %vm1818_vm8 = vcmp.eq.s32.totalorder %v64_v19, %v1802_v16  ;;  %vm1840_vm9 = vcmp.eq.s32.totalorder %v63_v23, %v1802_v16  ;;  %vm1858_vm10 = vcmp.eq.s32.totalorder %v62_v28, %v1802_v16  ;;  %v59_v42 = vand.u32 7, %v41_v39 }
  0x29   :  { %1339 = vmatmul.msk.bf16.gmra.mxu2 %vm235_vm2, %v1583_v4  ;;  %vm1878_vm11 = vcmp.eq.s32.totalorder %v61_v31, %v1802_v16  ;;  %vm1896_vm12 = vcmp.eq.s32.totalorder %v60_v38, %v1802_v16  ;;  %v58_v49 = vand.u32 7, %v40_v43  ;;  %v57_v53 = vand.u32 7, %v39_v50 }
  0x2a   :  { %vm1918_vm13 = vcmp.eq.s32.totalorder %v59_v42, %v1802_v16  ;;  %v38_v54 = vadd.s32 48, %v1799_v46  ;;  %v37_v57 = vadd.s32 40, %v1799_v46  ;;  %v36_v61 = vadd.s32 32, %v1799_v46 }
  0x2b   :  { %vm1938_vm14 = vcmp.eq.s32.totalorder %v58_v49, %v1802_v16  ;;  %vm1956_vm15 = vcmp.eq.s32.totalorder %v57_v53, %v1802_v16  ;;  %v35_v1 = vadd.s32 24, %v1799_v46  ;;  %v34_v6 = vadd.s32 16, %v1799_v46 }
  0x2c   :  { %v2374_v52 = vsel %vm1938_vm14, 4294967295, %v2373_v52  ;;  %v2376_v55 = vsel %vm1956_vm15, 4294967295, %v2375_v55  ;;  %v56_v56 = vand.u32 7, %v38_v54  ;;  %v55_v60 = vand.u32 7, %v37_v57 }
  0x2d   :  { %1376 = vmatmul.msk.bf16.vlgmr.msrb.gmra.mxu0 %vm235_vm2, %v406_v5  ;;  %v54_v34 = vand.u32 7, %v36_v61  ;;  %v33_v7 = vadd.s32 8, %v1799_v46  ;;  %v2383_v8 = vmov 0  ;;  %v52_v9 = vand.u32 7, %v34_v6 }
  0x2e   :  { %1297 = vmatmul.msk.bf16.gmra.mxu1 %vm235_vm2, %v194_v59  ;;  %vm1974_vm0 = vcmp.eq.s32.totalorder %v56_v56, %v1802_v16  ;;  %v2377_v59 = vmov 0  ;;  %vm1994_vm1 = vcmp.eq.s32.totalorder %v55_v60, %v1802_v16  ;;  %v2385_v11 = vmov 0 }
  0x2f   :  { %v2378_v59 = vsel %vm1974_vm0, 4294967295, %v2377_v59  ;;  %v2380_v33 = vsel %vm1994_vm1, 4294967295, %v2379_v33  ;;  %v51_v10 = vand.u32 7, %v33_v7  ;;  %vm2048_vm5 = vcmp.eq.s32.totalorder %v52_v9, %v1802_v16 }
  0x30   :  { %1340 = vmatmul.msk.bf16.vlgmr.msrb.gmra.mxu3 %vm235_vm2, %v1753_v2  ;;  %v47_v2 = vadd.s32 120, %v1799_v46  ;;  %v2386_v11 = vsel %vm2048_vm5, 4294967295, %v2385_v11  ;;  %v2387_v12 = vmov 0  ;;  %v50_v40 = vand.u32 7, %v1799_v46 }
  0x31   :  { %vm2053_vm3 = vcmp.eq.s32.totalorder %v51_v10, %v1802_v16  ;;  %v2389_v46 = vmov 0 }
  0x32   :  { %v65_v15 = vand.u32 7, %v47_v2  ;;  %v2388_v12 = vsel %vm2053_vm3, 4294967295, %v2387_v12  ;;  %vm2085_vm6 = vcmp.eq.s32.totalorder %v50_v40, %v1802_v16 }
  0x33   :  { %v2390_v46 = vsel %vm2085_vm6, 4294967295, %v2389_v46 }
  0x34   :  { %vm1806_vm7 = vcmp.eq.s32.totalorder %v65_v15, %v1802_v16 }
  0x35   :  { %1380 = vmatpush.msk.msrb.mxu2 %vm1806_vm7, %v1680_v21  ;;  %1412 = vmatpush.msk.msra.mxu0 %vm1806_vm7, %v1680_v21 }
  0x36   :  { %1396 = vmatpush.msk.msra.mxu3 %vm1806_vm7, %v1680_v21  ;;  %1428 = vmatpush.msk.msra.mxu1 %vm1806_vm7, %v1680_v21 }
  0x37   :  { %1381 = vmatpush.msk.msrb.mxu2 %vm1818_vm8, %v1680_v21  ;;  %1413 = vmatpush.msk.msra.mxu0 %vm1818_vm8, %v1680_v21 }
  0x38   :  { %1397 = vmatpush.msk.msra.mxu3 %vm1818_vm8, %v1680_v21  ;;  %1429 = vmatpush.msk.msra.mxu1 %vm1818_vm8, %v1680_v21 }
  0x39   :  { %1382 = vmatpush.msk.msrb.mxu2 %vm1840_vm9, %v1680_v21  ;;  %1414 = vmatpush.msk.msra.mxu0 %vm1840_vm9, %v1680_v21 }
  0x3a   :  { %1398 = vmatpush.msk.msra.mxu3 %vm1840_vm9, %v1680_v21  ;;  %1430 = vmatpush.msk.msra.mxu1 %vm1840_vm9, %v1680_v21 }
  0x3b   :  { %1383 = vmatpush.msk.msrb.mxu2 %vm1858_vm10, %v1680_v21  ;;  %1415 = vmatpush.msk.msra.mxu0 %vm1858_vm10, %v1680_v21 }
  0x3c   :  { %1399 = vmatpush.msk.msra.mxu3 %vm1858_vm10, %v1680_v21  ;;  %1431 = vmatpush.msk.msra.mxu1 %vm1858_vm10, %v1680_v21 }
  0x3d   :  { %1377 = vmatmul.msk.bf16.gmra.mxu0 %vm235_vm2, %v407_v13  ;;  %1384 = vmatpush.msk.msrb.mxu2 %vm1878_vm11, %v1680_v21 }
  0x3e   :  { %1378 = vmatmul.msk.bf16.vlgmr.msrb.gmra.mxu1 %vm235_vm2, %v406_v5  ;;  %1416 = vmatpush.msk.msra.mxu0 %vm1878_vm11, %v1680_v21  ;;  %v53_v5 = vand.u32 7, %v35_v1 }
  0x3f   :  { %1400 = vmatpush.msk.msra.mxu3 %vm1878_vm11, %v1680_v21  ;;  %1432 = vmatpush.msk.msra.mxu1 %vm1878_vm11, %v1680_v21 }
  0x40   :  { %1341 = vmatmul.msk.bf16.gmra.mxu3 %vm235_vm2, %v1583_v4  ;;  %1385 = vmatpush.msk.msrb.mxu2 %vm1896_vm12, %v1680_v21  ;;  %v2381_v4 = vmov 0  ;;  %vm2031_vm4 = vcmp.eq.s32.totalorder %v53_v5, %v1802_v16 }
  0x41   :  { %1417 = vmatpush.msk.msra.mxu0 %vm1896_vm12, %v1680_v21  ;;  %1401 = vmatpush.msk.msra.mxu3 %vm1896_vm12, %v1680_v21  ;;  %v2384_v8 = vsel %vm2031_vm4, 4294967295, %v2383_v8 }
  0x42   :  { %1433 = vmatpush.msk.msra.mxu1 %vm1896_vm12, %v1680_v21  ;;  %1386 = vmatpush.msk.msrb.mxu2 %vm1918_vm13, %v1680_v21 }
  0x43   :  { %1418 = vmatpush.msk.msra.mxu0 %vm1918_vm13, %v1680_v21  ;;  %1402 = vmatpush.msk.msra.mxu3 %vm1918_vm13, %v1680_v21 }
  0x44   :  { %1434 = vmatpush.msk.msra.mxu1 %vm1918_vm13, %v1680_v21  ;;  %1387 = vmatpush.msk.msrb.mxu2 %vm1938_vm14, %v1680_v21 }
  0x45   :  { %1419 = vmatpush.msk.msra.mxu0 %vm1938_vm14, %v1680_v21  ;;  %1403 = vmatpush.msk.msra.mxu3 %vm1938_vm14, %v1680_v21 }
  0x46   :  { %1435 = vmatpush.msk.msra.mxu1 %vm1938_vm14, %v1680_v21  ;;  %1388 = vmatpush.msk.msrb.mxu2 %vm1956_vm15, %v1680_v21 }
  0x47   :  { %1420 = vmatpush.msk.msra.mxu0 %vm1956_vm15, %v1680_v21  ;;  %1404 = vmatpush.msk.msra.mxu3 %vm1956_vm15, %v1680_v21 }
  0x48   :  { %1436 = vmatpush.msk.msra.mxu1 %vm1956_vm15, %v1680_v21  ;;  %1389 = vmatpush.msk.msrb.mxu2 %vm1974_vm0, %v1680_v21 }
  0x49   :  { %1421 = vmatpush.msk.msra.mxu0 %vm1974_vm0, %v1680_v21  ;;  %1405 = vmatpush.msk.msra.mxu3 %vm1974_vm0, %v1680_v21 }
  0x4a   :  { %1437 = vmatpush.msk.msra.mxu1 %vm1974_vm0, %v1680_v21  ;;  %1390 = vmatpush.msk.msrb.mxu2 %vm1994_vm1, %v1680_v21 }
  0x4b   :  { %1422 = vmatpush.msk.msra.mxu0 %vm1994_vm1, %v1680_v21  ;;  %1406 = vmatpush.msk.msra.mxu3 %vm1994_vm1, %v1680_v21 }
  0x4c   :  { %1438 = vmatpush.msk.msra.mxu1 %vm1994_vm1, %v1680_v21 }
  0x4e   :  { %1379 = vmatmul.msk.bf16.gmra.mxu1 %vm235_vm2, %v407_v13  ;;  %vm2012_vm2 = vcmp.eq.s32.totalorder %v54_v34, %v1802_v16 }
  0x4f   :  { %v2382_v4 = vsel %vm2012_vm2, 4294967295, %v2381_v4  ;;  %1391 = vmatpush.msk.msrb.mxu2 %vm2012_vm2, %v1680_v21  ;;  %1423 = vmatpush.msk.msra.mxu0 %vm2012_vm2, %v1680_v21 }
  0x50   :  { %1407 = vmatpush.msk.msra.mxu3 %vm2012_vm2, %v1680_v21  ;;  %1439 = vmatpush.msk.msra.mxu1 %vm2012_vm2, %v1680_v21 }
  0x51   :  { %1392 = vmatpush.msk.msrb.mxu2 %vm2031_vm4, %v1680_v21  ;;  %1424 = vmatpush.msk.msra.mxu0 %vm2031_vm4, %v1680_v21 }
  0x52   :  { %1408 = vmatpush.msk.msra.mxu3 %vm2031_vm4, %v1680_v21  ;;  %1440 = vmatpush.msk.msra.mxu1 %vm2031_vm4, %v1680_v21 }
  0x53   :  { %1393 = vmatpush.msk.msrb.mxu2 %vm2048_vm5, %v1680_v21  ;;  %1425 = vmatpush.msk.msra.mxu0 %vm2048_vm5, %v1680_v21 }
  0x54   :  { %1409 = vmatpush.msk.msra.mxu3 %vm2048_vm5, %v1680_v21  ;;  %1441 = vmatpush.msk.msra.mxu1 %vm2048_vm5, %v1680_v21 }
  0x55   :  { %1394 = vmatpush.msk.msrb.mxu2 %vm2053_vm3, %v1680_v21  ;;  %1426 = vmatpush.msk.msra.mxu0 %vm2053_vm3, %v1680_v21 }
  0x56   :  { %1410 = vmatpush.msk.msra.mxu3 %vm2053_vm3, %v1680_v21  ;;  %1442 = vmatpush.msk.msra.mxu1 %vm2053_vm3, %v1680_v21 }
  0x57   :  { %1395 = vmatpush.msk.msrb.mxu2 %vm2085_vm6, %v1680_v21  ;;  %1427 = vmatpush.msk.msra.mxu0 %vm2085_vm6, %v1680_v21 }
  0x58   :  { %1411 = vmatpush.msk.msra.mxu3 %vm2085_vm6, %v1680_v21  ;;  %1443 = vmatpush.msk.msra.mxu1 %vm2085_vm6, %v1680_v21 }
  0x5a   :  { %1550 = vmatpush.msk.msrb.mxu1 %vm1806_vm7, %v1680_v21 }
  0x5c   :  { %1551 = vmatpush.msk.msrb.mxu1 %vm1818_vm8, %v1680_v21 }
  0x5e   :  { %1552 = vmatpush.msk.msrb.mxu1 %vm1840_vm9, %v1680_v21 }
  0x60   :  { %1553 = vmatpush.msk.msrb.mxu1 %vm1858_vm10, %v1680_v21 }
  0x62   :  { %1554 = vmatpush.msk.msrb.mxu1 %vm1878_vm11, %v1680_v21 }
  0x64   :  { %1555 = vmatpush.msk.msrb.mxu1 %vm1896_vm12, %v1680_v21 }
  0x66   :  { %1556 = vmatpush.msk.msrb.mxu1 %vm1918_vm13, %v1680_v21 }
  0x68   :  { %1557 = vmatpush.msk.msrb.mxu1 %vm1938_vm14, %v1680_v21 }
  0x6a   :  { %1558 = vmatpush.msk.msrb.mxu1 %vm1956_vm15, %v1680_v21  ;;  %vm2393_vm15 = vsmask.f32 256 }
  0x6c   :  { %1559 = vmatpush.msk.msrb.mxu1 %vm1974_vm0, %v1680_v21  ;;  %vm761_vm0 = vcmask 1043456  }
  0x6e   :  { %1560 = vmatpush.msk.msrb.mxu1 %vm1994_vm1, %v1680_v21  ;;  %vm719_vm1 = vsmask.f32 4368 }
  0x6f   :  { %vm2222_vm14 = vmor %vm2393_vm15, %vm719_vm1  ;;  %vm2407_vm15 = vnez %v2386_v11  ;;  %vm2409_vm1 = vnez %v2390_v46 }
  0x70   :  { %1561 = vmatpush.msk.msrb.mxu1 %vm2012_vm2, %v1680_v21 }
  0x72   :  { %1562 = vmatpush.msk.msrb.mxu1 %vm2031_vm4, %v1680_v21  ;;  %vm2349_vm4 = vsmask.f32 7938 }
  0x74   :  { %1563 = vmatpush.msk.msrb.mxu1 %vm2048_vm5, %v1680_v21 }
  0x76   :  { %1564 = vmatpush.msk.msrb.mxu1 %vm2053_vm3, %v1680_v21  ;;  %vm2350_vm3 = vsmask.f32 256 }
  0x78   :  { %1565 = vmatpush.msk.msrb.mxu1 %vm2085_vm6, %v1680_v21  ;;  %vm698_vm6 = vcmask 1040384  }
  0x79   :  { %vm2198_vm5 = vmand %vm698_vm6, %vm2350_vm3 }
  0x7a   :  { %vm708_vm2 = vmand %vm698_vm6, %vm2349_vm4 }
  0x9a   :  { %v1829_v25 = vpop.f32.mrf.mxu0 }
  0x9b   :  { %v1831_v26 = vpop.f32.mrf.mxu1 }
  0x9c   :  { %v1875_v36 = vpop.f32.mrf.mxu2 }
  0x9d   :  { %v346_v15 = vadd.f32 %v1875_v36, %v1829_v25 }
  0xa2   :  { %v1907_v44 = vpop.f32.mrf.mxu0 }
  0xa3   :  { %v1909_v47 = vpop.f32.mrf.mxu1  ;;  %v1929_v51 = vpop.f32.mrf.mxu3 }
  0xa4   :  { %v347_v58 = vpop.f32.mrf.mxu2 }
  0xa5   :  { %v348_v16 = vadd.f32 %v347_v58, %v1907_v44 }
  0xaa   :  { %v463_v0 = vpop.f32.mrf.mxu0 }
  0xab   :  { %v1985_v63 = vpop.f32.mrf.mxu1  ;;  %v258_v3 = vpop.f32.mrf.mxu3  ;;  %v492_v20 = vadd.f32 %v463_v0, %v346_v15 }
  0xac   :  { %v350_v2 = vpop.f32.mrf.mxu2 }
  0xad   :  { %v351_v25 = vadd.f32 %v350_v2, %v1929_v51 }
  0xb2   :  { %v465_v13 = vpop.f32.mrf.mxu0 }
  0xb3   :  { %v2063_v45 = vpop.f32.mrf.mxu1  ;;  %v364_v14 = vpop.f32.mrf.mxu3  ;;  %v494_v23 = vadd.f32 %v465_v13, %v348_v16 }
  0xb4   :  { %v352_v28 = vpop.f32.mrf.mxu2  ;;  %v365_v56 = vadd.f32 %v364_v14, %v1831_v26 }
  0xb5   :  { %v502_v29 = vadd.f32 %v494_v23, %v492_v20  ;;  %v353_v32 = vadd.f32 %v352_v28, %v258_v3 }
  0xba   :  { %v468_v17 = vpop.f32.mrf.mxu0 }
  0xbb   :  { %v482_v19 = vpop.f32.mrf.mxu1  ;;  %v366_v24 = vpop.f32.mrf.mxu3  ;;  %v496_v31 = vadd.f32 %v468_v17, %v351_v25 }
  0xbc   :  { %v367_v53 = vadd.f32 %v366_v24, %v1909_v47  ;;  %v493_v0 = vadd.f32 %v482_v19, %v365_v56 }
  0xbd   :  { %v503_v39 = vadd.f32 %v502_v29, %v496_v31 }
  0xc2   :  { %v470_v36 = vpop.f32.mrf.mxu0 }
  0xc3   :  { %v484_v38 = vpop.f32.mrf.mxu1  ;;  %v498_v42 = vadd.f32 %v470_v36, %v353_v32  ;;  %v369_v43 = vpop.f32.mrf.mxu3 }
  0xc4   :  { %v370_v57 = vadd.f32 %v369_v43, %v1985_v63  ;;  %v495_v58 = vadd.f32 %v484_v38, %v367_v53 }
  0xc5   :  { %v504_v44 = vadd.f32 %v503_v39, %v498_v42 }
  0xc6   :  { %v595_v47 = vadd.f32 %v495_v58, %v493_v0 }
  0xc7   :  { %v505_v49 = vrot.slane %v504_v44, 4 }
  0xc9   :  { %v506_v50 = vadd.f32 %v505_v49, %v504_v44 }
  0xcb   :  { %v487_v51 = vpop.f32.mrf.mxu1  ;;  %v507_v54 = vrot.slane %v506_v50, 2  ;;  %v371_v61 = vpop.f32.mrf.mxu3 }
  0xcc   :  { %v497_v34 = vadd.f32 %v487_v51, %v370_v57  ;;  %v372_v3 = vadd.f32 %v371_v61, %v2063_v45 }
  0xcd   :  { %v508_v60 = vadd.f32 %v507_v54, %v506_v50 }
  0xce   :  { %v596_v63 = vadd.f32 %v595_v47, %v497_v34 }
  0xcf   :  { %v509_v1 = vrot.slane %v508_v60, 1 }
  0xd1   :  { %v510_v26 = vadd.f32 %v509_v1, %v508_v60 }
  0xd3   :  { %v489_v5 = vpop.f32.mrf.mxu1  ;;  %527 = vmatmul.f32.vlgmr.msrb.gmra.mxu2 %v510_v26 }
  0xd4   :  { %v499_v6 = vadd.f32 %v489_v5, %v372_v3 }
  0xd6   :  { %v597_v7 = vadd.f32 %v596_v63, %v499_v6 }
  0xd8   :  { %v598_v9 = vrot.slane %v597_v7, 4 }
  0xda   :  { %v599_v10 = vadd.f32 %v598_v9, %v597_v7 }
  0xdc   :  { %v600_v45 = vrot.slane %v599_v10, 2 }
  0xde   :  { %v601_v13 = vadd.f32 %v600_v45, %v599_v10  ;;  %v1514_v10 = vld [vmem:[#allocation3 + $0xb0] sm:$0xf]  ;;  %v1617_v45 = vld [vmem:[#allocation3 + $0xb4] sm:$0xf0] }
  0xe0   :  { %v602_v40 = vrot.slane %v601_v13, 1 }
  0xe2   :  { %v603_v2 = vadd.f32 %v602_v40, %v601_v13  ;;  %v1515_v13 = vor.u32 %v1617_v45, %v1514_v10  ;;  %v1510_v40 = vld [vmem:[#allocation3 + $0xa0] sm:$0xf]  ;;  %v1540_v10 = vld [vmem:[#allocation3 + $0x210] sm:$0xf]  ;;  %v1631_v45 = vld [vmem:[#allocation3 + $0x214] sm:$0xf0] }
  0xe4   :  { %620 = vmatmul.f32.vlgmr.msra.gmra.mxu0 %v603_v2  ;;  %998 = vmatpush.bf16.msrb.mxu3 %v1515_v13  ;;  %v1616_v2 = vld [vmem:[#allocation3 + $0xa4] sm:$0xf0]  ;;  %v1498_v13 = vld [vmem:[#allocation3 + $0x70] sm:$0xf] }
 0x156   :  { %v528_v14 = vpop.f32.mrf.mxu2 }
 0x157   :  { %v531_v15 = vmul.f32 0.001953125, %v528_v14  ;;  %v1511_v14 = vor.u32 %v1616_v2, %v1510_v40  ;;  %v1541_v2 = vor.u32 %v1631_v45, %v1540_v10  ;;  %v1486_v10 = vld [vmem:[#allocation3 + $0x40] sm:$0xf]  ;;  %v1610_v45 = vld [vmem:[#allocation3 + $0x44] sm:$0xf0] }
 0x159   :  { %v532_v16 = vperm.slane %v531_v15, 0  ;;  %999 = vmatpush.bf16.msrb.mxu3 %v1511_v14  ;;  %v1613_v14 = vld [vmem:[#allocation3 + $0x74] sm:$0xf0] }
 0x15b   :  { %v2163_v17 = vsub.f32 %v492_v20, %v532_v16  ;;  %v2165_v19 = vsub.f32 %v494_v23, %v532_v16  ;;  %v2167_v24 = vsub.f32 %v496_v31, %v532_v16  ;;  %v2169_v25 = vsub.f32 %v498_v42, %v532_v16  ;;  %v1548_v16 = vld [vmem:[#allocation3 + $0x230] sm:$0xf] }
 0x15d   :  { %v537_v28 = vmul.f32 %v2163_v17, %v2163_v17  ;;  %v538_v29 = vmul.f32 %v2165_v19, %v2165_v19  ;;  %v539_v32 = vmul.f32 %v2167_v24, %v2167_v24  ;;  %v540_v20 = vmul.f32 %v2169_v25, %v2169_v25 }
 0x15f   :  { %v541_v36 = vadd.f32 %v538_v29, %v537_v28  ;;  %v1633_v28 = vld [vmem:[#allocation3 + $0x234] sm:$0xf0] }
 0x161   :  { %v621_v38 = vpop.f32.mrf.mxu0  ;;  %v542_v23 = vadd.f32 %v541_v36, %v539_v32  ;;  %v1549_v32 = vor.u32 %v1633_v28, %v1548_v16  ;;  %v1506_v36 = vld [vmem:[#allocation3 + $0x90] sm:$0xf]  ;;  %v1499_v16 = vor.u32 %v1613_v14, %v1498_v13  ;;  %v1623_v28 = vld [vmem:[#allocation3 + $0x154] sm:$0xf0] }
 0x162   :  { %v624_v39 = vmul.f32 0.001953125, %v621_v38  ;;  %v1615_v38 = vld [vmem:[#allocation3 + $0x94] sm:$0xf0] }
 0x163   :  { %v543_v31 = vadd.f32 %v542_v23, %v540_v20  ;;  %v1507_v20 = vor.u32 %v1615_v38, %v1506_v36  ;;  %1105 = vmatpush.bf16.msrb.mxu0 %v1549_v32  ;;  %v1536_v36 = vld [vmem:[#allocation3 + $0x200] sm:$0xf]  ;;  %v1630_v38 = vld [vmem:[#allocation3 + $0x204] sm:$0xf0] }
 0x164   :  { %v625_v43 = vperm.slane %v624_v39, 0 }
 0x165   :  { %v544_v50 = vrot.slane %v543_v31, 4  ;;  %1000 = vmatpush.bf16.msrb.mxu3 %v1507_v20 }
 0x166   :  { %v2179_v42 = vsub.f32 %v493_v0, %v625_v43  ;;  %v2181_v44 = vsub.f32 %v495_v58, %v625_v43  ;;  %v2183_v49 = vsub.f32 %v497_v34, %v625_v43  ;;  %v2185_v51 = vsub.f32 %v499_v6, %v625_v43  ;;  %v704_v43 = vld [vmem:[#allocation2 + $0xc] sm:$0x1] }
 0x167   :  { %v545_v56 = vadd.f32 %v544_v50, %v543_v31  ;;  %v701_v31 = vld [vmem:[#allocation2] sm:$0x1] }
 0x168   :  { %v630_v53 = vmul.f32 %v2179_v42, %v2179_v42  ;;  %v631_v54 = vmul.f32 %v2181_v44, %v2181_v44  ;;  %v632_v57 = vmul.f32 %v2183_v49, %v2183_v49  ;;  %v633_v58 = vmul.f32 %v2185_v51, %v2185_v51 }
 0x169   :  { %v546_v61 = vrot.slane %v545_v56, 2  ;;  %v702_v50 = vsel %vm2198_vm5, 0, %v701_v31  ;;  %v1537_v31 = vor.u32 %v1630_v38, %v1536_v36  ;;  %v1643_v36 = vld [vmem:[%s2338_s2 + $0x5] ss:$0 sm:$0xff] }
 0x16a   :  { %v634_v60 = vadd.f32 %v631_v54, %v630_v53  ;;  %v705_v53 = vsel %vm2198_vm5, 0, %v704_v43  ;;  %v709_v54 = vld [vmem:[#allocation2 + $0x8] sm:$0x1]  ;;  %703 = vst [vmem:[#allocation2] sm:$0x1] %v702_v50 }
 0x16b   :  { %v547_v34 = vadd.f32 %v546_v61, %v545_v56  ;;  %v712_v56 = vld [vmem:[#allocation2 + $0x14] sm:$0x1]  ;;  %706 = vst [vmem:[#allocation2 + $0xc] sm:$0x1] %v705_v53  ;;  %v1474_v61 = vld [vmem:[#allocation3 + $0x170] sm:$0xf] }
 0x16c   :  { %v635_v0 = vadd.f32 %v634_v60, %v632_v57  ;;  %v710_v57 = vsel %vm708_vm2, 0, %v709_v54  ;;  %v713_v60 = vsel %vm708_vm2, 0, %v712_v56  ;;  %v1494_v43 = vld [vmem:[#allocation3 + $0x60] sm:$0xf]  ;;  %v1612_v50 = vld [vmem:[#allocation3 + $0x64] sm:$0xf0] }
 0x16d   :  { %v548_v47 = vrot.slane %v547_v34, 1  ;;  %711 = vst [vmem:[#allocation2 + $0x8] sm:$0x1] %v710_v57  ;;  %v1462_v53 = vld [vmem:[#allocation3 + $0x140] sm:$0xf] }
 0x16e   :  { %v636_v1 = vadd.f32 %v635_v0, %v633_v58  ;;  %v1625_v58 = vld [vmem:[#allocation3 + $0x174] sm:$0xf0]  ;;  %714 = vst [vmem:[#allocation2 + $0x14] sm:$0x1] %v713_v60  ;;  %v1622_v54 = vld [vmem:[#allocation3 + $0x144] sm:$0xf0]  ;;  %v1495_v60 = vor.u32 %v1612_v50, %v1494_v43 }
 0x16f   :  { %v549_v26 = vadd.f32 %v548_v47, %v547_v34  ;;  %v1475_v0 = vor.u32 %v1625_v58, %v1474_v61  ;;  %v1544_v34 = vld [vmem:[#allocation3 + $0x220] sm:$0xf]  ;;  %v593_v56 = vld [vmem:[%s2338_s2 + $0x4] sm:$0x1]  ;;  %v1463_v61 = vor.u32 %v1622_v54, %v1462_v53  ;;  %v1532_v58 = vld [vmem:[#allocation3 + $0x1f0] sm:$0xf] }
 0x170   :  { %v637_v3 = vrot.slane %v636_v1, 4  ;;  %v1619_v54 = vld [vmem:[#allocation3 + $0x114] sm:$0xf0] }
 0x171   :  { %566 = vmatmul.f32.vlgmr.msra.gmra.mxu3 %v549_v26  ;;  %v1614_v26 = vld [vmem:[#allocation3 + $0x84] sm:$0xf0]  ;;  %919 = vmatpush.bf16.msra.mxu2 %v1475_v0  ;;  %v1629_v0 = vld [vmem:[#allocation3 + $0x1f4] sm:$0xf0] }
 0x172   :  { %v638_v5 = vadd.f32 %v637_v3, %v636_v1  ;;  %v1632_v1 = vld [vmem:[#allocation3 + $0x224] sm:$0xf0]  ;;  %v1502_v3 = vld [vmem:[#allocation3 + $0x80] sm:$0xf] }
 0x173   :  { %v1545_v47 = vor.u32 %v1632_v1, %v1544_v34  ;;  %v1533_v34 = vor.u32 %v1629_v0, %v1532_v58  ;;  %v1490_v1 = vld [vmem:[#allocation3 + $0x50] sm:$0xf] }
 0x174   :  { %v639_v63 = vrot.slane %v638_v5, 2 }
 0x175   :  { %1106 = vmatpush.bf16.msrb.mxu0 %v1545_v47  ;;  %v1611_v47 = vld [vmem:[#allocation3 + $0x54] sm:$0xf0] }
 0x176   :  { %v640_v6 = vadd.f32 %v639_v63, %v638_v5  ;;  %v1503_v5 = vor.u32 %v1614_v26, %v1502_v3  ;;  %v1470_v63 = vld [vmem:[#allocation3 + $0x160] sm:$0xf]  ;;  %v1458_v3 = vld [vmem:[#allocation3 + $0x130] sm:$0xf] }
 0x178   :  { %v641_v7 = vrot.slane %v640_v6, 1  ;;  %1001 = vmatpush.bf16.msrb.mxu3 %v1503_v5  ;;  %v1491_v5 = vor.u32 %v1611_v47, %v1490_v1  ;;  %v1446_v47 = vld [vmem:[#allocation3 + $0x100] sm:$0xf] }
 0x179   :  { %1107 = vmatpush.bf16.msrb.mxu0 %v1541_v2  ;;  %v1454_v2 = vld [vmem:[#allocation3 + $0x120] sm:$0xf] }
 0x17a   :  { %v642_v9 = vadd.f32 %v641_v7, %v640_v6  ;;  %v1624_v6 = vld [vmem:[#allocation3 + $0x164] sm:$0xf0] }
 0x17c   :  { %659 = vmatmul.f32.vlgmr.msra.gmra.mxu1 %v642_v9  ;;  %v1471_v9 = vor.u32 %v1624_v6, %v1470_v63  ;;  %1002 = vmatpush.bf16.msrb.mxu3 %v1499_v16  ;;  %v1621_v63 = vld [vmem:[#allocation3 + $0x134] sm:$0xf0]  ;;  %v1528_v6 = vld [vmem:[#allocation3 + $0x1e0] sm:$0xf]  ;;  %v1620_v16 = vld [vmem:[#allocation3 + $0x124] sm:$0xf0] }
 0x17d   :  { %1108 = vmatpush.bf16.msrb.mxu0 %v1537_v31  ;;  %v1455_v38 = vor.u32 %v1620_v16, %v1454_v2 }
 0x17e   :  { %920 = vmatpush.bf16.msra.mxu2 %v1471_v9  ;;  %v1628_v9 = vld [vmem:[#allocation3 + $0x1e4] sm:$0xf0] }
 0x180   :  { %1003 = vmatpush.bf16.msrb.mxu3 %v1495_v60 }
 0x181   :  { %1109 = vmatpush.bf16.msrb.mxu0 %v1533_v34 }
 0x184   :  { %1004 = vmatpush.bf16.msrb.mxu3 %v1491_v5 }
 0x1f9   :  { %v660_v15 = vpop.f32.mrf.mxu1 }
 0x1fa   :  { %v663_v29 = vmul.f32 0.001953125, %v660_v15  ;;  %v1466_v15 = vld [vmem:[#allocation3 + $0x150] sm:$0xf] }
 0x1fb   :  { %v1467_v32 = vor.u32 %v1623_v28, %v1466_v15  ;;  %v1529_v15 = vor.u32 %v1628_v9, %v1528_v6  ;;  %v1524_v28 = vld [vmem:[#allocation3 + $0x1d0] sm:$0xf] }
 0x1fc   :  { %v2195_v23 = vadd.f32 1e-05, %v663_v29 }
 0x1fd   :  { %921 = vmatpush.bf16.msra.mxu2 %v1467_v32  ;;  %1110 = vmatpush.bf16.msrb.mxu0 %v1529_v15 }
 0x1fe   :  { %1645 = vrsqrt.f32 %v2195_v23  ;;  %vm671_vm2 = vweird.f32 %v2195_v23 }
 0x201   :  { %922 = vmatpush.bf16.msra.mxu2 %v1463_v61 }
 0x204   :  { %v1646_v7 = vpop.eup %1645 }
 0x205   :  { %v666_v40 = vmul.f32 %v1646_v7, %v2195_v23  ;;  %vm672_vm6 = vweird.f32 %v1646_v7  ;;  %v1487_v23 = vor.u32 %v1610_v45, %v1486_v10 }
 0x206   :  { %vm673_vm4 = vmor %vm671_vm2, %vm672_vm6 }
 0x207   :  { %v667_v29 = vmul.f32 %v1646_v7, %v666_v40  ;;  %v1459_v40 = vor.u32 %v1621_v63, %v1458_v3  ;;  %1005 = vmatpush.bf16.msrb.mxu3 %v1487_v23 }
 0x209   :  { %v668_v20 = vmul.f32 0.5, %v667_v29  ;;  %v1627_v29 = vld [vmem:[#allocation3 + $0x1d4] sm:$0xf0]  ;;  %923 = vmatpush.bf16.msra.mxu2 %v1459_v40 }
 0x20b   :  { %v669_v57 = vsub.f32 1.5, %v668_v20  ;;  %v1525_v20 = vor.u32 %v1627_v29, %v1524_v28 }
 0x20d   :  { %v670_v26 = vmul.f32 %v1646_v7, %v669_v57  ;;  %v1626_v57 = vld [vmem:[#allocation3 + $0x1c4] sm:$0xf0]  ;;  %924 = vmatpush.bf16.msra.mxu2 %v1455_v38  ;;  %1111 = vmatpush.bf16.msrb.mxu0 %v1525_v20 }
 0x20e   :  { %v763_v38 = vld [vmem:[#allocation2] sm:$0xf] }
 0x20f   :  { %v674_v13 = vsel %vm673_vm4, %v1646_v7, %v670_v26  ;;  %v1450_v7 = vld [vmem:[#allocation3 + $0x110] sm:$0xf] }
 0x210   :  { %v675_v14 = vmul.f32 %v674_v13, %v593_v56  ;;  %v1520_v56 = vld [vmem:[#allocation3 + $0x1c0] sm:$0xf]  ;;  %v1451_v34 = vor.u32 %v1619_v54, %v1450_v7 }
 0x211   :  { %v1521_v1 = vor.u32 %v1626_v57, %v1520_v56 }
 0x212   :  { %v676_v32 = vperm.slane %v675_v14, 0  ;;  %925 = vmatpush.bf16.msra.mxu2 %v1451_v34 }
 0x213   :  { %1112 = vmatpush.bf16.msrb.mxu0 %v1521_v1  ;;  %v770_v1 = vld [vmem:[#allocation2 + $0xc] sm:$0xf] }
 0x214   :  { %v677_v31 = vmul.f32 %v676_v32, %v2179_v42  ;;  %v678_v43 = vmul.f32 %v676_v32, %v2181_v44  ;;  %v679_v50 = vmul.f32 %v676_v32, %v2183_v49  ;;  %v680_v53 = vmul.f32 %v676_v32, %v2185_v51  ;;  %v1618_v42 = vld [vmem:[#allocation3 + $0x104] sm:$0xf0] }
 0x215   :  { %v1447_v6 = vor.u32 %v1618_v42, %v1446_v47 }
 0x216   :  { %v682_v60 = vadd.f32 %v1643_v36, %v677_v31  ;;  %v683_v61 = vadd.f32 %v1643_v36, %v678_v43  ;;  %v684_v58 = vadd.f32 %v1643_v36, %v679_v50  ;;  %v685_v0 = vadd.f32 %v1643_v36, %v680_v53  ;;  %v767_v53 = vld [vmem:[#allocation2 + $0x8] sm:$0x1] }
 0x217   :  { %926 = vmatpush.bf16.msra.mxu2 %v1447_v6 }
 0x218   :  { %vm686_vm4 = vcmp.gt.f32.partialorder %v682_v60, 0.0  ;;  %vm687_vm6 = vcmp.gt.f32.partialorder %v683_v61, 0.0  ;;  %vm688_vm2 = vcmp.gt.f32.partialorder %v684_v58, 0.0  ;;  %vm689_vm3 = vcmp.gt.f32.partialorder %v685_v0, 0.0 }
 0x219   :  { %v690_v44 = vmul.f32 0.2, %v682_v60  ;;  %v691_v49 = vmul.f32 0.2, %v683_v61  ;;  %v692_v51 = vmul.f32 0.2, %v684_v58 }
 0x21a   :  { %v693_v3 = vmul.f32 0.2, %v685_v0 }
 0x21b   :  { %v694_v26 = vsel %vm686_vm4, %v682_v60, %v690_v44  ;;  %v695_v5 = vsel %vm687_vm6, %v683_v61, %v691_v49  ;;  %v696_v63 = vsel %vm688_vm2, %v684_v58, %v692_v51  ;;  %1566 = vmatpush.msk.msrb.mxu2 %vm1806_vm7, %v1680_v21  ;;  %v774_v61 = vld [vmem:[#allocation2 + $0x14] sm:$0x1]  ;;  %vm2399_vm7 = vnez %v2374_v52 }
 0x21c   :  { %v697_v9 = vsel %vm689_vm3, %v685_v0, %v693_v3  ;;  %v715_v10 = vpack.c.bf16 %v694_v26, %v694_v26  ;;  %v716_v45 = vpack.c.bf16 %v695_v5, %v695_v5  ;;  %v717_v13 = vpack.c.bf16 %v696_v63, %v696_v63 }
 0x21d   :  { %v718_v40 = vpack.c.bf16 %v697_v9, %v697_v9  ;;  %vm2396_vm3 = vsmask.f32 7938  ;;  %1567 = vmatpush.msk.msrb.mxu2 %vm1818_vm8, %v1680_v21  ;;  %vm2400_vm8 = vnez %v2358_v35 }
 0x21e   :  { %v722_v2 = vshrl.u32 %v715_v10, 16  ;;  %v730_v14 = vshrl.u32 %v716_v45, 16  ;;  %v739_v15 = vshrl.u32 %v717_v13, 16  ;;  %v725_v23 = vshll.u32 %v715_v10, 16  ;;  %vm2231_vm4 = vmand %vm761_vm0, %vm2396_vm3 }
 0x21f   :  { %v747_v16 = vshrl.u32 %v718_v40, 16  ;;  %v733_v36 = vshll.u32 %v716_v45, 16  ;;  %v742_v7 = vshll.u32 %v717_v13, 16  ;;  %v750_v43 = vshll.u32 %v718_v40, 16  ;;  %1568 = vmatpush.msk.msrb.mxu2 %vm1840_vm9, %v1680_v21 }
 0x220   :  { %v724_v29 = vrot.slane %v722_v2, 7  ;;  %v732_v32 = vrot.slane %v730_v14, 7  ;;  %v741_v20 = vrot.slane %v739_v15, 7  ;;  %vm2401_vm9 = vnez %v2376_v55 }
 0x221   :  { %v749_v31 = vrot.slane %v747_v16, 7  ;;  %1569 = vmatpush.msk.msrb.mxu2 %vm1858_vm10, %v1680_v21  ;;  %vm2402_vm10 = vnez %v2378_v59  ;;  %vm2408_vm0 = vnez %v2388_v12 }
 0x222   :  { %v727_v54 = vor.u32 %v725_v23, %v724_v29  ;;  %v728_v56 = vrot.slane %v724_v29, 4  ;;  %v735_v57 = vor.u32 %v733_v36, %v732_v32  ;;  %v737_v60 = vrot.slane %v732_v32, 4 }
 0x223   :  { %v744_v18 = vor.u32 %v742_v7, %v741_v20  ;;  %v745_v58 = vrot.slane %v741_v20, 4  ;;  %v752_v0 = vor.u32 %v750_v43, %v749_v31  ;;  %v754_v34 = vrot.slane %v749_v31, 4  ;;  %1570 = vmatpush.msk.msrb.mxu2 %vm1878_vm11, %v1680_v21 }
 0x224   :  { %v736_v47 = vsel %vm2222_vm14, %v728_v56, %v735_v57  ;;  %v764_v42 = vsel %vm2231_vm4, %v727_v54, %v763_v38  ;;  %v768_v44 = vsel %vm2198_vm5, %v737_v60, %v767_v53  ;;  %vm2403_vm11 = vnez %v2380_v33 }
 0x225   :  { %765 = vst [vmem:[#allocation2] sm:$0xf] %v764_v42  ;;  %v775_v22 = vsel %vm2198_vm5, %v754_v34, %v774_v61  ;;  %v771_v49 = vsel %vm2231_vm4, %v744_v18, %v770_v1  ;;  %v753_v51 = vsel %vm2222_vm14, %v745_v58, %v752_v0  ;;  %1571 = vmatpush.msk.msrb.mxu2 %vm1896_vm12, %v1680_v21 }
 0x226   :  { %766 = vst [vmem:[#allocation2 + $0x4] sm:$0xf] %v736_v47  ;;  %vm2404_vm12 = vnez %v2356_v62  ;;  %vm2406_vm14 = vnez %v2384_v8 }
 0x227   :  { %769 = vst [vmem:[#allocation2 + $0x8] sm:$0x1] %v768_v44  ;;  %1572 = vmatpush.msk.msrb.mxu2 %vm1918_vm13, %v1680_v21  ;;  %vm2405_vm13 = vnez %v2382_v4 }
 0x228   :  { %776 = vst [vmem:[#allocation2 + $0x14] sm:$0x1] %v775_v22 }
 0x229   :  { %772 = vst [vmem:[#allocation2 + $0xc] sm:$0xf] %v771_v49  ;;  %1573 = vmatpush.msk.msrb.mxu2 %vm2399_vm7, %v1680_v21 }
 0x22a   :  { %773 = vst [vmem:[#allocation2 + $0x10] sm:$0xf] %v753_v51 }
 0x22b   :  { %1574 = vmatpush.msk.msrb.mxu2 %vm2401_vm9, %v1680_v21 }
 0x22c   :  { %v777_v27 = vld [vmem:[#allocation2] sm:$0xf] }
 0x22d   :  { %v1608_v30 = vld [vmem:[#allocation2] sm:$0xff]  ;;  %v1516_v3 = vrot.slane %v777_v27, 9  ;;  %v800_v26 = vshrl.u32 %v777_v27, 16  ;;  %v803_v5 = vshll.u32 %v777_v27, 16  ;;  %1575 = vmatpush.msk.msrb.mxu2 %vm2402_vm10, %v1680_v21 }
 0x22e   :  { %v778_v39 = vld [vmem:[#allocation2 + $0x4] sm:$0xf]  ;;  %v779_v63 = vld [vmem:[#allocation2 + $0x8] sm:$0x1]  ;;  %1006 = vmatmul.bf16.vlgmr.msrb.gmra.mxu3 %v1608_v30 }
 0x22f   :  { %v1021_v6 = vrot.slane %v778_v39, 5  ;;  %v809_v37 = vshll.u32 %v778_v39, 16  ;;  %v813_v9 = vshrl.u32 %v778_v39, 16  ;;  %v1024_v41 = vrot.slane %v779_v63, 5  ;;  %1576 = vmatpush.msk.msrb.mxu2 %vm2403_vm11, %v1680_v21  ;;  %v782_v58 = vld [vmem:[#allocation2 + $0x14] sm:$0x1] }
 0x230   :  { %v802_v10 = vrot.slane %v800_v26, 4  ;;  %v805_v45 = vrot.slane %v803_v5, 5  ;;  %v819_v13 = vshll.u32 %v779_v63, 16  ;;  %v780_v15 = vld [vmem:[#allocation2 + $0xc] sm:$0xf]  ;;  %v1031_v42 = vrot.slane %v782_v58, 5 }
 0x231   :  { %v1022_v48 = vsel %vm2400_vm8, %v1516_v3, %v1021_v6  ;;  %v1023_v40 = vrot.slane %v1021_v6, 4  ;;  %v811_v2 = vrot.slane %v809_v37, 5  ;;  %v815_v14 = vrot.slane %v813_v9, 4  ;;  %v781_v28 = vld [vmem:[#allocation2 + $0x10] sm:$0xf]  ;;  %1577 = vmatpush.msk.msrb.mxu2 %vm2405_vm13, %v1680_v21 }
 0x232   :  { %v806_v16 = vor.u32 %v805_v45, %v802_v10  ;;  %v1049_v29 = vunpack.c.l.b16 %v1022_v48  ;;  %v824_v38 = vshrl.u32 %v780_v15, 16  ;;  %v827_v20 = vshll.u32 %v780_v15, 16  ;;  %v1609_v8 = vld [vmem:[#allocation2 + $0xc] sm:$0xff] }
 0x233   :  { %v1025_v52 = vsel %vm2400_vm8, %v1023_v40, %v1024_v41  ;;  %v816_v23 = vor.u32 %v815_v14, %v811_v2  ;;  %v821_v31 = vrot.slane %v819_v13, 5  ;;  %v833_v43 = vshll.u32 %v781_v28, 16  ;;  %1578 = vmatpush.msk.msrb.mxu2 %vm2406_vm14, %v1680_v21 }
 0x234   :  { %v1050_v32 = vunpack.c.l.b16 %v1025_v52  ;;  %v807_v36 = vrot.slane %v806_v16, 4  ;;  %v1028_v53 = vrot.slane %v781_v28, 5  ;;  %v826_v56 = vrot.slane %v824_v38, 4 }
 0x235   :  { %v817_v7 = vrot.slane %v816_v23, 4  ;;  %v829_v57 = vrot.slane %v827_v20, 5  ;;  %v835_v61 = vrot.slane %v833_v43, 5  ;;  %v837_v33 = vshrl.u32 %v781_v28, 16  ;;  %1579 = vmatpush.msk.msrb.mxu2 %vm2407_vm15, %v1680_v21 }
 0x236   :  { %v1053_v55 = vpack.c.b16 %v1050_v32, %v1049_v29  ;;  %v812_v50 = vsel %vm2404_vm12, %v807_v36, %v811_v2  ;;  %v1030_v34 = vrot.slane %v1028_v53, 4  ;;  %v1517_v47 = vrot.slane %v780_v15, 9 }
 0x237   :  { %v822_v59 = vsel %vm2404_vm12, %v817_v7, %v821_v31  ;;  %v863_v54 = vunpack.c.l.b16 %v812_v50  ;;  %v839_v0 = vrot.slane %v837_v33, 4  ;;  %v830_v1 = vor.u32 %v829_v57, %v826_v56  ;;  %1580 = vmatpush.msk.msrb.mxu2 %vm2408_vm0, %v1680_v21 }
 0x238   :  { %1113 = vmatmul.bf16.vlgmr.msrb.gmra.mxu0 %v1053_v55  ;;  %v864_v60 = vunpack.c.l.b16 %v822_v59  ;;  %v843_v44 = vshll.u32 %v782_v58, 16  ;;  %v1032_v22 = vsel %vm2400_vm8, %v1030_v34, %v1031_v42  ;;  %v1029_v11 = vsel %vm2400_vm8, %v1517_v47, %v1028_v53 }
 0x239   :  { %v840_v4 = vor.u32 %v839_v0, %v835_v61  ;;  %v831_v49 = vrot.slane %v830_v1, 4  ;;  %1581 = vmatpush.msk.msrb.mxu2 %vm2409_vm1, %v1680_v21  ;;  %v1052_v30 = vunpack.c.l.b16 %v1032_v22  ;;  %v1051_v3 = vunpack.c.l.b16 %v1029_v11  ;;  %v567_v21 = vpop.f32.mrf.mxu3 }
 0x23a   :  { %v867_v18 = vpack.c.b16 %v864_v60, %v863_v54  ;;  %v845_v27 = vrot.slane %v843_v44, 5  ;;  %v570_v11 = vmul.f32 0.001953125, %v567_v21  ;;  %v500_v21 = vld [vmem:[%s2338_s2] sm:$0x1] }
 0x23b   :  { %v841_v51 = vrot.slane %v840_v4, 4  ;;  %v836_v12 = vsel %vm2404_vm12, %v831_v49, %v835_v61  ;;  %v1054_v26 = vpack.c.b16 %v1052_v30, %v1051_v3 }
 0x23c   :  { %927 = vmatmul.bf16.vlgmr.msra.gmra.mxu2 %v867_v18  ;;  %v865_v5 = vunpack.c.l.b16 %v836_v12 }
 0x23d   :  { %v846_v39 = vsel %vm2404_vm12, %v841_v51, %v845_v27  ;;  %v571_v27 = vadd.f32 1e-05, %v570_v11 }
 0x23e   :  { %1011 = vmatmul.bf16.gmra.mxu3 %v1609_v8  ;;  %v866_v63 = vunpack.c.l.b16 %v846_v39 }
 0x23f   :  { %1647 = vrsqrt.f32 %v571_v27  ;;  %vm578_vm6 = vweird.f32 %v571_v27 }
 0x240   :  { %v868_v6 = vpack.c.b16 %v866_v63, %v865_v5 }
 0x245   :  { %v1648_v30 = vpop.eup %1647 }
 0x246   :  { %v573_v12 = vmul.f32 %v1648_v30, %v571_v27  ;;  %vm579_vm5 = vweird.f32 %v1648_v30 }
 0x247   :  { %vm580_vm2 = vmor %vm578_vm6, %vm579_vm5 }
 0x248   :  { %1118 = vmatmul.bf16.gmra.mxu0 %v1054_v26  ;;  %v574_v39 = vmul.f32 %v1648_v30, %v573_v12 }
 0x24a   :  { %v575_v26 = vmul.f32 0.5, %v574_v39 }
 0x24c   :  { %932 = vmatmul.bf16.gmra.mxu2 %v868_v6  ;;  %v576_v6 = vsub.f32 1.5, %v575_v26 }
 0x2b1   :  { %v1007_v46 = vpop.f32.mrf.mxu3 }
 0x2b5   :  { %v1114_v37 = vpop.f32.mrf.mxu0 }
 0x2b9   :  { %v1009_v9 = vpop.f32.mrf.mxu3 }
 0x2bd   :  { %v1116_v41 = vpop.f32.mrf.mxu0 }
 0x2bf   :  { %v928_v35 = vpop.f32.mrf.mxu2 }
 0x2c0   :  { %v1008_v62 = vadd.f32 %v1007_v46, %v928_v35  ;;  %v577_v46 = vmul.f32 %v1648_v30, %v576_v6 }
 0x2c1   :  { %v1012_v45 = vpop.f32.mrf.mxu3 }
 0x2c2   :  { %v1124_v15 = vadd.f32 %v1114_v37, %v1008_v62 }
 0x2c5   :  { %v1119_v13 = vpop.f32.mrf.mxu0 }
 0x2c7   :  { %v930_v10 = vpop.f32.mrf.mxu2 }
 0x2c8   :  { %v1010_v40 = vadd.f32 %v1009_v9, %v930_v10  ;;  %v581_v9 = vsel %vm580_vm2, %v1648_v30, %v577_v46 }
 0x2c9   :  { %v1014_v28 = vpop.f32.mrf.mxu3  ;;  %v582_v10 = vmul.f32 %v581_v9, %v500_v21 }
 0x2ca   :  { %v1125_v14 = vadd.f32 %v1116_v41, %v1010_v40  ;;  %v1128_v40 = vld [vmem:[%s2338_s2 + $0x2] sm:$0x1] }
 0x2cc   :  { %v1130_v29 = vadd.f32 %v1125_v14, %v1124_v15 }
 0x2cd   :  { %v1121_v32 = vpop.f32.mrf.mxu0 }
 0x2cf   :  { %v933_v48 = vpop.f32.mrf.mxu2 }
 0x2d0   :  { %v1013_v2 = vadd.f32 %v1012_v45, %v933_v48  ;;  %v583_v48 = vperm.slane %v582_v10, 0 }
 0x2d2   :  { %v1126_v16 = vadd.f32 %v1119_v13, %v1013_v2 }
 0x2d4   :  { %v1131_v36 = vadd.f32 %v1130_v29, %v1126_v16  ;;  %v1642_v29 = vld [vmem:[%s2338_s2 + $0x1] ss:$0 sm:$0xff] }
 0x2d7   :  { %v935_v52 = vpop.f32.mrf.mxu2 }
 0x2d8   :  { %v1015_v23 = vadd.f32 %v1014_v28, %v935_v52  ;;  %v586_v28 = vmul.f32 %v583_v48, %v2167_v24  ;;  %v587_v52 = vmul.f32 %v583_v48, %v2169_v25 }
 0x2da   :  { %v1127_v38 = vadd.f32 %v1121_v32, %v1015_v23  ;;  %v1644_v32 = vld [vmem:[%s2338_s2 + $0x3] ss:$0 sm:$0xff] }
 0x2dc   :  { %v1132_v20 = vadd.f32 %v1131_v36, %v1127_v38 }
 0x2de   :  { %v1133_v7 = vrot.slane %v1132_v20, 4 }
 0x2e0   :  { %v1134_v31 = vadd.f32 %v1133_v7, %v1132_v20 }
 0x2e2   :  { %v1135_v43 = vrot.slane %v1134_v31, 2 }
 0x2e4   :  { %v1136_v55 = vadd.f32 %v1135_v43, %v1134_v31  ;;  %v592_v43 = vadd.f32 %v1642_v29, %v587_v52 }
 0x2e6   :  { %v1137_v50 = vrot.slane %v1136_v55, 1 }
 0x2e8   :  { %v1138_v53 = vadd.f32 %v1137_v50, %v1136_v55 }
 0x2ea   :  { %1155 = vmatmul.f32.vlgmr.msrb.gmra.mxu1 %v1138_v53 }
 0x367   :  { %v1156_v59 = vpop.f32.mrf.mxu1 }
 0x368   :  { %v1159_v54 = vmul.f32 0.001953125, %v1156_v59 }
 0x36a   :  { %v1160_v56 = vperm.slane %v1159_v54, 0 }
 0x36c   :  { %v1161_v57 = vsub.f32 %v1124_v15, %v1160_v56  ;;  %v1162_v60 = vsub.f32 %v1125_v14, %v1160_v56  ;;  %v1163_v61 = vsub.f32 %v1126_v16, %v1160_v56  ;;  %v1164_v33 = vsub.f32 %v1127_v38, %v1160_v56 }
 0x36d   :  { %v584_v15 = vmul.f32 %v583_v48, %v2163_v17  ;;  %v585_v16 = vmul.f32 %v583_v48, %v2165_v19  ;;  %v591_v19 = vadd.f32 %v1642_v29, %v586_v28 }
 0x36e   :  { %v1165_v18 = vmul.f32 %v1161_v57, %v1161_v57  ;;  %v1166_v58 = vmul.f32 %v1162_v60, %v1162_v60  ;;  %v1167_v0 = vmul.f32 %v1163_v61, %v1163_v61  ;;  %v1168_v1 = vmul.f32 %v1164_v33, %v1164_v33 }
 0x36f   :  { %v589_v17 = vadd.f32 %v1642_v29, %v584_v15  ;;  %v590_v31 = vadd.f32 %v1642_v29, %v585_v16 }
 0x370   :  { %v1169_v34 = vadd.f32 %v1166_v58, %v1165_v18 }
 0x372   :  { %v1170_v4 = vadd.f32 %v1169_v34, %v1167_v0 }
 0x374   :  { %v1171_v47 = vadd.f32 %v1170_v4, %v1168_v1 }
 0x376   :  { %v1172_v42 = vrot.slane %v1171_v47, 4 }
 0x378   :  { %v1173_v44 = vadd.f32 %v1172_v42, %v1171_v47 }
 0x37a   :  { %v1174_v8 = vrot.slane %v1173_v44, 2 }
 0x37c   :  { %v1175_v22 = vadd.f32 %v1174_v8, %v1173_v44 }
 0x37e   :  { %v1176_v49 = vrot.slane %v1175_v22, 1 }
 0x380   :  { %v1177_v51 = vadd.f32 %v1176_v49, %v1175_v22 }
 0x382   :  { %1194 = vmatmul.f32.vlgmr.msrb.gmra.mxu2 %v1177_v51 }
 0x405   :  { %v1195_v3 = vpop.f32.mrf.mxu2 }
 0x406   :  { %v1198_v5 = vmul.f32 0.001953125, %v1195_v3 }
 0x408   :  { %v1199_v63 = vadd.f32 1e-05, %v1198_v5 }
 0x40a   :  { %1649 = vrsqrt.f32 %v1199_v63  ;;  %vm1206_vm4 = vweird.f32 %v1199_v63 }
 0x410   :  { %v1650_v37 = vpop.eup %1649 }
 0x411   :  { %v1201_v35 = vmul.f32 %v1650_v37, %v1199_v63  ;;  %vm1207_vm3 = vweird.f32 %v1650_v37 }
 0x412   :  { %vm1208_vm7 = vmor %vm1206_vm4, %vm1207_vm3 }
 0x413   :  { %v1202_v41 = vmul.f32 %v1650_v37, %v1201_v35 }
 0x415   :  { %v1203_v45 = vmul.f32 0.5, %v1202_v41 }
 0x417   :  { %v1204_v13 = vsub.f32 1.5, %v1203_v45 }
 0x419   :  { %v1205_v62 = vmul.f32 %v1650_v37, %v1204_v13 }
 0x41b   :  { %v1209_v2 = vsel %vm1208_vm7, %v1650_v37, %v1205_v62 }
 0x41c   :  { %v1210_v14 = vmul.f32 %v1209_v2, %v1128_v40 }
 0x41e   :  { %v1211_v23 = vperm.slane %v1210_v14, 0 }
 0x420   :  { %v1212_v36 = vmul.f32 %v1211_v23, %v1161_v57  ;;  %v1213_v38 = vmul.f32 %v1211_v23, %v1162_v60  ;;  %v1214_v20 = vmul.f32 %v1211_v23, %v1163_v61  ;;  %v1215_v7 = vmul.f32 %v1211_v23, %v1164_v33 }
 0x422   :  { %v1217_v24 = vadd.f32 %v1644_v32, %v1212_v36  ;;  %v1218_v55 = vadd.f32 %v1644_v32, %v1213_v38  ;;  %v1219_v25 = vadd.f32 %v1644_v32, %v1214_v20  ;;  %v1220_v50 = vadd.f32 %v1644_v32, %v1215_v7 }
 0x424   :  { %v1221_v53 = vadd.f32 %v1217_v24, %v589_v17  ;;  %v1222_v59 = vadd.f32 %v1218_v55, %v590_v31  ;;  %v1223_v54 = vadd.f32 %v1219_v25, %v591_v19  ;;  %v1224_v56 = vadd.f32 %v1220_v50, %v592_v43 }
 0x426   :  { %vm1225_vm8 = vcmp.gt.f32.partialorder %v1221_v53, 0.0  ;;  %vm1226_vm9 = vcmp.gt.f32.partialorder %v1222_v59, 0.0  ;;  %vm1227_vm10 = vcmp.gt.f32.partialorder %v1223_v54, 0.0  ;;  %vm1228_vm11 = vcmp.gt.f32.partialorder %v1224_v56, 0.0 }
 0x427   :  { %v1229_v57 = vmul.f32 0.2, %v1221_v53  ;;  %v1230_v60 = vmul.f32 0.2, %v1222_v59  ;;  %v1231_v61 = vmul.f32 0.2, %v1223_v54 }
 0x428   :  { %v1232_v33 = vmul.f32 0.2, %v1224_v56 }
 0x429   :  { %v1233_v18 = vsel %vm1225_vm8, %v1221_v53, %v1229_v57  ;;  %v1234_v58 = vsel %vm1226_vm9, %v1222_v59, %v1230_v60  ;;  %v1235_v0 = vsel %vm1227_vm10, %v1223_v54, %v1231_v61 }
 0x42a   :  { %v1236_v34 = vsel %vm1228_vm11, %v1224_v56, %v1232_v33  ;;  %1237 = vst [vmem:[%s2339_s3] sm:$0xff] %v1233_v18 }
 0x42b   :  { %1238 = vst [vmem:[%s2339_s3 + $0x8] sm:$0xff] %v1234_v58 }
 0x42c   :  { %1239 = vst [vmem:[%s2339_s3 + $0x10] sm:$0xff] %v1235_v0 }
 0x42d   :  { %1240 = vst [vmem:[%s2339_s3 + $0x18] sm:$0xff] %v1236_v34 }
 0x42e   :  { %1245 = vsyncpa [#allocation4], 1 }

</bundles_post_ra>
